<compile_context>
chip_gen: v7x
topology: tpu7x:2x2x1
jax: 0.10.0
libtpu: 0.0.40
codegen_flags: <defaults>
</compile_context>

<pallas_src>
import jax
import jax.numpy as jnp
from jax.experimental import pallas as pl
from jax.experimental.pallas import tpu as pltpu

EPS = 1e-5  # torch.nn.LayerNorm default eps


def generic_encoder_kernel(x_ref, w1_ref, b1_ref, w2_ref, b2_ref,
                           gamma_ref, beta_ref, o_ref):
    # --- pre_encoder: Linear(D_in -> H) + ReLU -------------------------------
    # x arrives straight from HBM as f32; cast to bf16 on the VPU just before
    # the MXU (free under the DMA/MXU), with f32 accumulation on the MXU.
    x = x_ref[...].astype(w1_ref.dtype)
    h = jnp.dot(x, w1_ref[...], preferred_element_type=jnp.float32)
    h = jnp.maximum(h + b1_ref[...], 0.0)                    # (tb, H) + (1, H)

    # --- Generic_Encoder.linear_layer: Linear(H -> L) ------------------------
    z = jnp.dot(h.astype(w2_ref.dtype), w2_ref[...],
                preferred_element_type=jnp.float32)
    z = z + b2_ref[...]                                       # (tb, L) + (1, L)

    # --- Generic_Encoder.normalization_layer = LayerNorm(L), f32 math --------
    # var = E[z^2] - mean^2: the two row reductions are independent so the XLU
    # can overlap them (shorter per-step tail than the serialized two-pass
    # form).  Requires the FULL latent dim L in this block (never tile L).
    inv_l = 1.0 / z.shape[-1]
    mean = jnp.sum(z, axis=-1, keepdims=True) * inv_l
    mean_sq = jnp.sum(z * z, axis=-1, keepdims=True) * inv_l
    var = jnp.maximum(mean_sq - mean * mean, 0.0)             # guard cancellation
    zn = (z - mean) * jax.lax.rsqrt(var + EPS)
    o_ref[...] = (zn * gamma_ref[...] + beta_ref[...]).astype(o_ref.dtype)


def _round_up(x, m):
    return ((x + m - 1) // m) * m


def _choose_tile_b(batch, requested):
    """Pick a batch tile: 128-aligned (fills the 128-wide v5e MXU M dim and is
    a fine multiple for v6e/v7x), never absurdly larger than the batch, and
    with an even grid length when possible so v7x's two TensorCores split the
    single 'parallel' grid axis evenly."""
    if batch <= 128:
        return batch                       # single block, full-dim (always legal)
    tb = max(128, _round_up(int(requested), 128))
    if tb >= batch:
        tb = max(128, _round_up(pl.cdiv(batch, 2), 128))      # keep >= 2 steps
    grid_b = pl.cdiv(batch, tb)
    if grid_b > 1 and grid_b % 2 == 1:
        alt = max(128, _round_up(pl.cdiv(batch, grid_b + 1), 128))
        if pl.cdiv(batch, alt) % 2 == 0:
            tb = alt
    return tb


def generic_encoder_forward(x, params, *, tile_b=512,
                            compute_dtype=jnp.bfloat16,
                            out_dtype=jnp.float32):
    """Generic_Encoder forward: LayerNorm(Linear(ReLU(Linear(x)))).

    x: [B, D_in] float32.  Returns rep: [B, latent_dims] in `out_dtype`
    (float32 matches the PyTorch module; pass jnp.bfloat16 to halve the
    dominant output HBM stream when the caller tolerates it).
    `tile_b` is a perf sweep parameter (512-1024 on v5e, 1024-2048 on v6e,
    2048-8192 on v7x for large batches)."""
    w1, b1, w2, b2, gamma, beta = params
    assert x.ndim == 2
    B, D_in = x.shape
    H = w1.shape[1]
    L = w2.shape[1]

    tb = _choose_tile_b(B, tile_b)
    grid_b = pl.cdiv(B, tb)

    # Matmul operands in bf16 (weights are tiny, one-time cast); biases and
    # LayerNorm affine stay f32.  x stays f32 in HBM and is cast in-kernel,
    # avoiding an extra full HBM read/write pass over the activations.
    w1_c = w1.astype(compute_dtype)
    w2_c = w2.astype(compute_dtype)
    b1_c = b1.reshape(1, H).astype(jnp.float32)
    b2_c = b2.reshape(1, L).astype(jnp.float32)
    gamma_c = gamma.reshape(1, L).astype(jnp.float32)
    beta_c = beta.reshape(1, L).astype(jnp.float32)

    w_item = jnp.dtype(compute_dtype).itemsize
    cost = pl.CostEstimate(
        flops=2 * grid_b * tb * (D_in * H + H * L),
        transcendentals=B,                                     # one rsqrt per row
        bytes_accessed=(B * D_in * x.dtype.itemsize            # x (f32, cast in-kernel)
                        + (D_in * H + H * L) * w_item          # W1, W2 (bf16)
                        + (H + 3 * L) * 4                      # b1, b2, gamma, beta
                        + B * L * jnp.dtype(out_dtype).itemsize),  # output
    )

    # Weights / biases use constant index maps -> fetched once, kept resident;
    # Buffered(1) disables their (useless) double buffer.
    const_buf = pl.Buffered(1)

    out = pl.pallas_call(
        generic_encoder_kernel,
        out_shape=jax.ShapeDtypeStruct((B, L), out_dtype),
        grid_spec=pltpu.PrefetchScalarGridSpec(
            num_scalar_prefetch=0,
            grid=(grid_b,),
            in_specs=[
                pl.BlockSpec((tb, D_in), lambda i: (i, 0)),                    # x tile (f32)
                pl.BlockSpec((D_in, H), lambda i: (0, 0), pipeline_mode=const_buf),  # W1
                pl.BlockSpec((1, H), lambda i: (0, 0), pipeline_mode=const_buf),     # b1
                pl.BlockSpec((H, L), lambda i: (0, 0), pipeline_mode=const_buf),     # W2
                pl.BlockSpec((1, L), lambda i: (0, 0), pipeline_mode=const_buf),     # b2
                pl.BlockSpec((1, L), lambda i: (0, 0), pipeline_mode=const_buf),     # gamma
                pl.BlockSpec((1, L), lambda i: (0, 0), pipeline_mode=const_buf),     # beta
            ],
            # Full L in one block (LayerNorm needs the whole latent dim per row).
            out_specs=pl.BlockSpec((tb, L), lambda i: (i, 0)),
        ),
        compiler_params=pltpu.CompilerParams(
            dimension_semantics=("parallel",),
            vmem_limit_bytes=32 * 1024 * 1024,  # matters on v5e's 16 MiB scoped default
        ),
        cost_estimate=cost,
    )(x, w1_c, b1_c, w2_c, b2_c, gamma_c, beta_c)

    return out


def init_params(key, d_in, hidden, latent):
    """Deterministic synthetic parameters (stand-in for nn.Linear/LayerNorm init)."""
    k1, k2, k3, k4 = jax.random.split(key, 4)
    # nn.Linear weight is [out, in]; store transposed [in, out] for x @ W.
    w1 = jax.random.uniform(k1, (d_in, hidden), jnp.float32, -0.1, 0.1)
    b1 = jax.random.uniform(k2, (1, hidden), jnp.float32, -0.1, 0.1)
    w2 = jax.random.uniform(k3, (hidden, latent), jnp.float32, -0.1, 0.1)
    b2 = jax.random.uniform(k4, (1, latent), jnp.float32, -0.1, 0.1)
    gamma = jnp.ones((1, latent), jnp.float32)   # LayerNorm weight init
    beta = jnp.zeros((1, latent), jnp.float32)   # LayerNorm bias init
    return (w1, b1, w2, b2, gamma, beta)


def reference_forward(x, params, compute_dtype=None):
    """Pure-JAX reference mirroring the PyTorch semantics.
    compute_dtype=None -> full f32 math; bf16 mirrors the kernel's MXU operands."""
    w1, b1, w2, b2, gamma, beta = params
    if compute_dtype is not None:
        x = x.astype(compute_dtype)
        w1 = w1.astype(compute_dtype)
        w2 = w2.astype(compute_dtype)
    h = jnp.maximum(jnp.dot(x, w1, preferred_element_type=jnp.float32) + b1, 0.0)
    if compute_dtype is not None:
        h = h.astype(compute_dtype)
    z = jnp.dot(h, w2, preferred_element_type=jnp.float32) + b2
    mean = jnp.mean(z, axis=-1, keepdims=True)
    var = jnp.mean((z - mean) ** 2, axis=-1, keepdims=True)
    return (z - mean) * jax.lax.rsqrt(var + EPS) * gamma + beta


if __name__ == "__main__":
    # Small but lane-aligned shapes: hidden = latent = 128 keeps every matmul
    # dim and the output store lane-dense.  B=500 exercises the ragged
    # last-block path (grid = cdiv(500, 256) = 2, last block partial) and the
    # even-grid choice that keeps both v7x TensorCores busy.
    B, D_IN, HIDDEN, LATENT = 500, 64, 128, 128

    key = jax.random.PRNGKey(0)
    kx, kp = jax.random.split(key)
    x = jax.random.normal(kx, (B, D_IN), jnp.float32)
    params = init_params(kp, D_IN, HIDDEN, LATENT)

    out = generic_encoder_forward(x, params, tile_b=512)
    out = jax.block_until_ready(out)
    assert out.shape == (B, LATENT)
    assert bool(jnp.all(jnp.isfinite(out)))

    # Strict check vs. a reference using the same bf16 matmul operands.
    ref_bf16 = reference_forward(x, params, compute_dtype=jnp.bfloat16)
    assert jnp.allclose(out, ref_bf16, atol=2e-3, rtol=2e-3), \
        "mismatch vs bf16-matched reference"

    # Loose sanity check vs. the full-f32 reference (bf16 operand rounding).
    ref_f32 = reference_forward(x, params)
    assert jnp.allclose(out, ref_f32, atol=5e-2, rtol=5e-2), \
        "mismatch vs f32 reference"

    print("KERNEL_OK")
</pallas_src>

<mosaic_0001>
module attributes {stable_mosaic.version = 11 : i64} {
  func.func @generic_encoder_kernel(%arg0: i32, %arg1: memref<256x64xf32, #tpu.memory_space<vmem>>, %arg2: memref<64x128xbf16, #tpu.memory_space<vmem>>, %arg3: memref<1x128xf32, #tpu.memory_space<vmem>>, %arg4: memref<128x128xbf16, #tpu.memory_space<vmem>>, %arg5: memref<1x128xf32, #tpu.memory_space<vmem>>, %arg6: memref<1x128xf32, #tpu.memory_space<vmem>>, %arg7: memref<1x128xf32, #tpu.memory_space<vmem>>, %arg8: memref<256x128xf32, #tpu.memory_space<vmem>>) attributes {dimension_semantics = [#tpu.dimension_semantics<parallel>], iteration_bounds = array<i64: 2>, scalar_prefetch = 0 : i64, scratch_operands = 0 : i64, tpu.core_type = #tpu.core_type<tc>, window_params = [{transform_indices = @transform_0, window_bounds = array<i64: 256, 64>}, {pipeline_mode = #tpu.pipeline_mode<synchronous>, transform_indices = @transform_1, window_bounds = array<i64: 64, 128>}, {pipeline_mode = #tpu.pipeline_mode<synchronous>, transform_indices = @transform_2, window_bounds = array<i64: 1, 128>}, {pipeline_mode = #tpu.pipeline_mode<synchronous>, transform_indices = @transform_3, window_bounds = array<i64: 128, 128>}, {pipeline_mode = #tpu.pipeline_mode<synchronous>, transform_indices = @transform_4, window_bounds = array<i64: 1, 128>}, {pipeline_mode = #tpu.pipeline_mode<synchronous>, transform_indices = @transform_5, window_bounds = array<i64: 1, 128>}, {pipeline_mode = #tpu.pipeline_mode<synchronous>, transform_indices = @transform_6, window_bounds = array<i64: 1, 128>}, {transform_indices = @transform_7, window_bounds = array<i64: 256, 128>}]} {
    %c0 = arith.constant 0 : index
    %c0_0 = arith.constant 0 : index
    %0 = vector.load %arg1[%c0, %c0_0] : memref<256x64xf32, #tpu.memory_space<vmem>>, vector<256x64xf32>
    %1 = arith.truncf %0 : vector<256x64xf32> to vector<256x64xbf16>
    %c0_1 = arith.constant 0 : index
    %c0_2 = arith.constant 0 : index
    %2 = vector.load %arg2[%c0_1, %c0_2] : memref<64x128xbf16, #tpu.memory_space<vmem>>, vector<64x128xbf16>
    %cst = arith.constant dense<0.000000e+00> : vector<256x128xf32>
    %3 = tpu.matmul %1, %2, %cst {dimension_numbers = #tpu.dot_dimension_numbers<[1], [0], [0], [1], [0, 0, 1, 1], [], []>} : vector<256x64xbf16>, vector<64x128xbf16>, vector<256x128xf32> -> vector<256x128xf32>
    %c0_3 = arith.constant 0 : index
    %c0_4 = arith.constant 0 : index
    %4 = vector.load %arg3[%c0_3, %c0_4] : memref<1x128xf32, #tpu.memory_space<vmem>>, vector<1x128xf32>
    %5 = vector.broadcast %4 : vector<1x128xf32> to vector<256x128xf32>
    %6 = arith.addf %3, %5 : vector<256x128xf32>
    %cst_5 = arith.constant 0.000000e+00 : f32
    %7 = vector.broadcast %cst_5 : f32 to vector<256x128xf32>
    %8 = arith.maximumf %6, %7 : vector<256x128xf32>
    %9 = arith.truncf %8 : vector<256x128xf32> to vector<256x128xbf16>
    %c0_6 = arith.constant 0 : index
    %c0_7 = arith.constant 0 : index
    %10 = vector.load %arg4[%c0_6, %c0_7] : memref<128x128xbf16, #tpu.memory_space<vmem>>, vector<128x128xbf16>
    %cst_8 = arith.constant dense<0.000000e+00> : vector<256x128xf32>
    %11 = tpu.matmul %9, %10, %cst_8 {dimension_numbers = #tpu.dot_dimension_numbers<[1], [0], [0], [1], [0, 0, 1, 1], [], []>} : vector<256x128xbf16>, vector<128x128xbf16>, vector<256x128xf32> -> vector<256x128xf32>
    %c0_9 = arith.constant 0 : index
    %c0_10 = arith.constant 0 : index
    %12 = vector.load %arg5[%c0_9, %c0_10] : memref<1x128xf32, #tpu.memory_space<vmem>>, vector<1x128xf32>
    %13 = vector.broadcast %12 : vector<1x128xf32> to vector<256x128xf32>
    %14 = arith.addf %11, %13 : vector<256x128xf32>
    %cst_11 = arith.constant dense<0.000000e+00> : vector<256xf32>
    %15 = vector.multi_reduction <add>, %14, %cst_11 [1] : vector<256x128xf32> to vector<256xf32>
    %16 = vector.shape_cast %15 : vector<256xf32> to vector<256x1xf32>
    %cst_12 = arith.constant 7.812500e-03 : f32
    %17 = vector.broadcast %cst_12 : f32 to vector<256x1xf32>
    %18 = arith.mulf %16, %17 : vector<256x1xf32>
    %19 = arith.mulf %14, %14 : vector<256x128xf32>
    %cst_13 = arith.constant dense<0.000000e+00> : vector<256xf32>
    %20 = vector.multi_reduction <add>, %19, %cst_13 [1] : vector<256x128xf32> to vector<256xf32>
    %21 = vector.shape_cast %20 : vector<256xf32> to vector<256x1xf32>
    %cst_14 = arith.constant 7.812500e-03 : f32
    %22 = vector.broadcast %cst_14 : f32 to vector<256x1xf32>
    %23 = arith.mulf %21, %22 : vector<256x1xf32>
    %24 = arith.mulf %18, %18 : vector<256x1xf32>
    %25 = arith.subf %23, %24 : vector<256x1xf32>
    %cst_15 = arith.constant 0.000000e+00 : f32
    %26 = vector.broadcast %cst_15 : f32 to vector<256x1xf32>
    %27 = arith.maximumf %25, %26 : vector<256x1xf32>
    %28 = vector.broadcast %18 : vector<256x1xf32> to vector<256x128xf32>
    %29 = arith.subf %14, %28 : vector<256x128xf32>
    %cst_16 = arith.constant 9.99999974E-6 : f32
    %30 = vector.broadcast %cst_16 : f32 to vector<256x1xf32>
    %31 = arith.addf %27, %30 : vector<256x1xf32>
    %32 = math.rsqrt %31 : vector<256x1xf32>
    %33 = vector.broadcast %32 : vector<256x1xf32> to vector<256x128xf32>
    %34 = arith.mulf %29, %33 : vector<256x128xf32>
    %c0_17 = arith.constant 0 : index
    %c0_18 = arith.constant 0 : index
    %35 = vector.load %arg6[%c0_17, %c0_18] : memref<1x128xf32, #tpu.memory_space<vmem>>, vector<1x128xf32>
    %36 = vector.broadcast %35 : vector<1x128xf32> to vector<256x128xf32>
    %37 = arith.mulf %34, %36 : vector<256x128xf32>
    %c0_19 = arith.constant 0 : index
    %c0_20 = arith.constant 0 : index
    %38 = vector.load %arg7[%c0_19, %c0_20] : memref<1x128xf32, #tpu.memory_space<vmem>>, vector<1x128xf32>
    %39 = vector.broadcast %38 : vector<1x128xf32> to vector<256x128xf32>
    %40 = arith.addf %37, %39 : vector<256x128xf32>
    %c0_21 = arith.constant 0 : index
    %c0_22 = arith.constant 0 : index
    %41 = vector.load %arg8[%c0_21, %c0_22] : memref<256x128xf32, #tpu.memory_space<vmem>>, vector<256x128xf32>
    tpu.vector_store %arg8[%c0_21, %c0_22], %40 {strides = array<i32>} : memref<256x128xf32, #tpu.memory_space<vmem>>, vector<256x128xf32>,
    return
  }
  func.func @transform_0(%arg0: i32) -> (i32, i32) {
    %c0_i32 = arith.constant 0 : i32
    %c0_i32_0 = arith.constant 0 : i32
    return %arg0, %c0_i32 : i32, i32
  }
  func.func @transform_1(%arg0: i32) -> (i32, i32) {
    %c0_i32 = arith.constant 0 : i32
    %c0_i32_0 = arith.constant 0 : i32
    %c0_i32_1 = arith.constant 0 : i32
    return %c0_i32, %c0_i32_0 : i32, i32
  }
  func.func @transform_2(%arg0: i32) -> (i32, i32) {
    %c0_i32 = arith.constant 0 : i32
    %c0_i32_0 = arith.constant 0 : i32
    %c0_i32_1 = arith.constant 0 : i32
    return %c0_i32, %c0_i32_0 : i32, i32
  }
  func.func @transform_3(%arg0: i32) -> (i32, i32) {
    %c0_i32 = arith.constant 0 : i32
    %c0_i32_0 = arith.constant 0 : i32
    %c0_i32_1 = arith.constant 0 : i32
    return %c0_i32, %c0_i32_0 : i32, i32
  }
  func.func @transform_4(%arg0: i32) -> (i32, i32) {
    %c0_i32 = arith.constant 0 : i32
    %c0_i32_0 = arith.constant 0 : i32
    %c0_i32_1 = arith.constant 0 : i32
    return %c0_i32, %c0_i32_0 : i32, i32
  }
  func.func @transform_5(%arg0: i32) -> (i32, i32) {
    %c0_i32 = arith.constant 0 : i32
    %c0_i32_0 = arith.constant 0 : i32
    %c0_i32_1 = arith.constant 0 : i32
    return %c0_i32, %c0_i32_0 : i32, i32
  }
  func.func @transform_6(%arg0: i32) -> (i32, i32) {
    %c0_i32 = arith.constant 0 : i32
    %c0_i32_0 = arith.constant 0 : i32
    %c0_i32_1 = arith.constant 0 : i32
    return %c0_i32, %c0_i32_0 : i32, i32
  }
  func.func @transform_7(%arg0: i32) -> (i32, i32) {
    %c0_i32 = arith.constant 0 : i32
    %c0_i32_0 = arith.constant 0 : i32
    return %arg0, %c0_i32 : i32, i32
  }
}

</mosaic_0001>

<bundles_post_ra>
// kernel: tpu_custom_call.1
= control target key start
LH: loop header
LB: loop body
LE: loop exit
PB: predicated region body
PF: predicated region fallthrough
CT: control target
= control target key end

     0   :  { %12 = vsyncpa [#allocation3], 0  ;;  %s2664_s0 = inlined_call_operand.vmem [shape: f32[500,64], index: 0, kind: input, shape index: {}]   ;;  %s2665_s1 = inlined_call_operand.vmem [shape: bf16[64,128], index: 1, kind: input, shape index: {}]   ;;  %s2666_s2 = inlined_call_operand.vmem [shape: f32[1,128], index: 2, kind: input, shape index: {}]   ;;  %s2667_s3 = inlined_call_operand.vmem [shape: bf16[128,128], index: 3, kind: input, shape index: {}]   ;;  %s2668_s4 = inlined_call_operand.vmem [shape: f32[1,128], index: 4, kind: input, shape index: {}]   ;;  %s2669_s5 = inlined_call_operand.vmem [shape: f32[1,128], index: 5, kind: input, shape index: {}]   ;;  %s2670_s6 = inlined_call_operand.vmem [shape: f32[1,128], index: 6, kind: input, shape index: {}]   ;;  %s2671_s7 = inlined_call_operand.hbm [shape: f32[500,128], index: 7, kind: output, shape index: {}]  }
   0x1   :  { %14 = vsyncpa [#allocation3 + $0x1], 0  ;;  %s1942_s24 = smov 0   ;;  %s1944_s25 = smov 0  }
   0x2   :  { %s1946_s26 = smov 0   ;;  %s1948_s27 = smov 0  }
   0x3 LB: > { %s1963_s28 = sadd.s32 4294967295, %s1897_s27   ;;  %s1522_s29 = sadd.s32 4294967294, %s1897_s27   ;;  %s1897_s27 = sphi %s1948_s27, %s2677_s27   ;;  %s1893_s26 = sphi %s1946_s26, %s2676_s26   ;;  %s1889_s25 = sphi %s1944_s25, %s2675_s25   ;;  %s1885_s24 = sphi %s1942_s24, %s2674_s24  }
   0x4   : > { %s1967_s30 = sadd.s32 1, %s1897_s27   ;;  %s179_s8 = sadd.s32 1, %s1893_s26 }
   0x5   : > { %s176_s9 = ssub.s32 %s1897_s27, %s1967_s30  ;;  %p189_p0 = scmp.ne.s32.totalorder %s1893_s26, %s1889_s25 }
   0x6   : > { %p177_p1 = scmp.eq.s32.totalorder %s176_s9, 0  ;;  %p190_p2 = scmp.eq.s32.totalorder %s1963_s28, 1 }
   0x7   : > { %p195_p3 = scmp.ne.s32.totalorder %s1889_s25, %s1885_s24  ;;  %p196_p4 = scmp.eq.s32.totalorder %s1522_s29, 1 }
   0x8   : > { %s1978_s10 = scalar_select %p177_p1, %s1893_s26, %s179_s8  }
   0x9   : > { %p1980_p5 = por %p190_p2, %p189_p0  ;;  %p1984_p6 = por %p196_p4, %p195_p3 }
   0xa   : > { %p1525_p7 = scmp.ge.s32.totalorder %s1897_s27, 1  ;;  %p249_p8 = scmp.lt.s32.totalorder %s1897_s27, 3 }
   0xc   : > { %p250_p9 = pnand %p1525_p7, %p249_p8 }
   0xd   : > { %v1759_v0 = vld [vmem:[%s2665_s1] sm:$0xff] (!%p250_p9)   ;;  %s1994_s15 = sshll.u32 (!%p250_p9), %s1963_s28, 5  ;;  %v1760_v1 = vld [vmem:[%s2665_s1 + $0x8] sm:$0xff] (!%p250_p9)   ;;  %v1761_v2 = vld [vmem:[%s2665_s1 + $0x10] sm:$0xff] (!%p250_p9)   ;;  %vm392_vm0 = vcmask (!%p250_p9), 523264   ;;  %s282_s21 = sand.u32 (!%p250_p9), 1, %s1889_s25  }
   0xe   : > { %253 = sbr.rel (%p250_p9) target bundleno = 787 (0x313), region = 48  ;;  %p290_p10 = scmp.lt.s32.totalorder (!%p250_p9), %s1994_s15, 62  ;;  %1615 = vmatprep.subr.bf16.mxu0 (!%p250_p9), %v1759_v0  ;;  %v1763_v3 = vld [vmem:[%s2667_s3] sm:$0xff] (!%p250_p9)   ;;  %v1764_v4 = vld [vmem:[%s2667_s3 + $0x8] sm:$0xff] (!%p250_p9)   ;;  %v1762_v7 = vld [vmem:[%s2665_s1 + $0x18] sm:$0xff] (!%p250_p9)  }
   0xf   : > { %1616 = vmatpush3.bf16.msra.mxu0 (!%p250_p9), %v1759_v0  ;;  %1703 = vmatprep.subr.bf16.mxu1 (!%p250_p9), %v1763_v3  ;;  %v1765_v9 = vld [vmem:[%s2667_s3 + $0x10] sm:$0xff] (!%p250_p9)   ;;  %v1766_v19 = vld [vmem:[%s2667_s3 + $0x18] sm:$0xff] (!%p250_p9)   ;;  %v1767_v21 = vld [vmem:[%s2667_s3 + $0x20] sm:$0xff] (!%p250_p9)   ;;  %s1526_s29 = sshll.u32 (!%p250_p9), %s282_s21, 8  ;;  %s2603_s16 = scalar_lea.sflag (!%p250_p9), [#allocation3], %s282_s21 }
  0x10   : > { %1617 = vmatprep.subr.bf16.mxu0 (!%p250_p9), %v1760_v1  ;;  %1711 = vmatpush3.bf16.msra.mxu1 (!%p250_p9), %v1763_v3  ;;  %v1768_v24 = vld [vmem:[%s2667_s3 + $0x28] sm:$0xff] (!%p250_p9)   ;;  %v1769_v29 = vld [vmem:[%s2667_s3 + $0x30] sm:$0xff] (!%p250_p9)   ;;  %v1770_v59 = vld [vmem:[%s2667_s3 + $0x38] sm:$0xff] (!%p250_p9)   ;;  %s2364_s14 = scalar_lea.vmem (!%p250_p9), [#allocation2], %s1526_s29 }
  0x11   : > { %1704 = vmatprep.subr.bf16.mxu1 (!%p250_p9), %v1764_v4  ;;  %v2087_v60 = vld [vmem:[%s2666_s2] ss:$0 sm:$0xff] (!%p250_p9) }
  0x13   : > { %1618 = vmatpush3.bf16.msra.mxu0 (!%p250_p9), %v1760_v1 }
  0x14   : > { %1619 = vmatprep.subr.bf16.mxu0 (!%p250_p9), %v1761_v2  ;;  %1712 = vmatpush3.bf16.msra.mxu1 (!%p250_p9), %v1764_v4 }
  0x15   : > { %s291_s20 = scalar_select %p290_p10, %s1994_s15, 62  ;;  %1705 = vmatprep.subr.bf16.mxu1 %v1765_v9 }
  0x16   : > { %s1449_s17 = ssub.s32 (%p1980_p5), 63, %s1994_s15 }
  0x17   : > { %s1528_s23 = sshll.u32 %s291_s20, 3  ;;  %1620 = vmatpush3.bf16.msra.mxu0 %v1761_v2  ;;  %p1450_p11 = scmp.lt.s32.totalorder (%p1980_p5), %s1449_s17, 32 }
  0x18   : > { %s2010_s9 = scalar_lea.vmem %s2664_s0, %s1528_s23  ;;  %1621 = vmatprep.subr.bf16.mxu0 %v1762_v7  ;;  %1713 = vmatpush3.bf16.msra.mxu1 %v1765_v9 }
  0x19   : > { %v305_v5 = vld [vmem:[%s2010_s9] sm:$0xff]  ;;  %v306_v6 = vld [vmem:[%s2010_s9 + $0x8] sm:$0xff]  ;;  %v307_v10 = vld [vmem:[%s2010_s9 + $0x10] sm:$0xff]  ;;  %1706 = vmatprep.subr.bf16.mxu1 %v1766_v19 }
  0x1a   : > { %v337_v8 = vpack.c.bf16 %v306_v6, %v305_v5  ;;  %v308_v11 = vld [vmem:[%s2010_s9 + $0x18] sm:$0xff]  ;;  %v309_v12 = vld [vmem:[%s2010_s9 + $0x20] sm:$0xff]  ;;  %v310_v13 = vld [vmem:[%s2010_s9 + $0x28] sm:$0xff] }
  0x1b   : > { %v338_v14 = vpack.c.bf16 %v308_v11, %v307_v10  ;;  %1622 = vmatpush3.bf16.msra.mxu0 %v1762_v7  ;;  %v339_v15 = vpack.c.bf16 %v310_v13, %v309_v12  ;;  %v311_v16 = vld [vmem:[%s2010_s9 + $0x30] sm:$0xff]  ;;  %v312_v17 = vld [vmem:[%s2010_s9 + $0x38] sm:$0xff]  ;;  %v313_v18 = vld [vmem:[%s2010_s9 + $0x40] sm:$0xff] }
  0x1c   : > { %1623 = vmatprep.mubr.msk.bf16.mxu0 %vm392_vm0, %v337_v8  ;;  %1655 = vmatprep.subr.bf16.mxu0 %v1763_v3  ;;  %v314_v20 = vld [vmem:[%s2010_s9 + $0x48] sm:$0xff]  ;;  %v340_v22 = vpack.c.bf16 %v312_v17, %v311_v16  ;;  %v315_v25 = vld [vmem:[%s2010_s9 + $0x50] sm:$0xff]  ;;  %v316_v26 = vld [vmem:[%s2010_s9 + $0x58] sm:$0xff] }
  0x1d   : > { %1714 = vmatpush3.bf16.msra.mxu1 %v1766_v19  ;;  %v341_v23 = vpack.c.bf16 %v314_v20, %v313_v18  ;;  %v317_v27 = vld [vmem:[%s2010_s9 + $0x60] sm:$0xff]  ;;  %v318_v28 = vld [vmem:[%s2010_s9 + $0x68] sm:$0xff]  ;;  %v342_v30 = vpack.c.bf16 %v316_v26, %v315_v25  ;;  %v319_v32 = vld [vmem:[%s2010_s9 + $0x70] sm:$0xff] }
  0x1e   : > { %1624 = vmatmul.mubr.msk.bf16.vlgmr.msra.gmra.mrb[0].mxu0 %vm392_vm0, %v338_v14  ;;  %1707 = vmatprep.subr.bf16.mxu1 %v1767_v21  ;;  %v343_v31 = vpack.c.bf16 %v318_v28, %v317_v27  ;;  %v320_v33 = vld [vmem:[%s2010_s9 + $0x78] sm:$0xff]  ;;  %v321_v34 = vld [vmem:[%s2010_s9 + $0x80] sm:$0xff]  ;;  %v322_v35 = vld [vmem:[%s2010_s9 + $0x88] sm:$0xff] }
  0x1f   : > { %1627 = vmatprep.mubr.msk.bf16.mxu0 %vm392_vm0, %v339_v15  ;;  %1656 = vmatpush3.bf16.msra.mxu0 %v1763_v3  ;;  %v344_v36 = vpack.c.bf16 %v320_v33, %v319_v32  ;;  %v345_v37 = vpack.c.bf16 %v322_v35, %v321_v34  ;;  %v323_v38 = vld [vmem:[%s2010_s9 + $0x90] sm:$0xff]  ;;  %v324_v39 = vld [vmem:[%s2010_s9 + $0x98] sm:$0xff]  ;;  %v325_v40 = vld [vmem:[%s2010_s9 + $0xa0] sm:$0xff] }
  0x20   : > { %1657 = vmatprep.subr.bf16.mxu0 %v1764_v4  ;;  %v326_v41 = vld [vmem:[%s2010_s9 + $0xa8] sm:$0xff]  ;;  %v346_v42 = vpack.c.bf16 %v324_v39, %v323_v38  ;;  %v327_v44 = vld [vmem:[%s2010_s9 + $0xb0] sm:$0xff]  ;;  %v328_v45 = vld [vmem:[%s2010_s9 + $0xb8] sm:$0xff] }
  0x21   : > { %1715 = vmatpush3.bf16.msra.mxu1 %v1767_v21  ;;  %v347_v43 = vpack.c.bf16 %v326_v41, %v325_v40  ;;  %v329_v46 = vld [vmem:[%s2010_s9 + $0xc0] sm:$0xff]  ;;  %v330_v47 = vld [vmem:[%s2010_s9 + $0xc8] sm:$0xff]  ;;  %v348_v48 = vpack.c.bf16 %v328_v45, %v327_v44  ;;  %v331_v50 = vld [vmem:[%s2010_s9 + $0xd0] sm:$0xff] }
  0x22   : > { %1708 = vmatprep.subr.bf16.mxu1 %v1768_v24  ;;  %v349_v49 = vpack.c.bf16 %v330_v47, %v329_v46  ;;  %v332_v51 = vld [vmem:[%s2010_s9 + $0xd8] sm:$0xff]  ;;  %v333_v52 = vld [vmem:[%s2010_s9 + $0xe0] sm:$0xff]  ;;  %v334_v53 = vld [vmem:[%s2010_s9 + $0xe8] sm:$0xff] }
  0x23   : > { %1658 = vmatpush3.bf16.msra.mxu0 %v1764_v4  ;;  %v350_v54 = vpack.c.bf16 %v332_v51, %v331_v50  ;;  %v351_v55 = vpack.c.bf16 %v334_v53, %v333_v52  ;;  %v335_v56 = vld [vmem:[%s2010_s9 + $0xf0] sm:$0xff]  ;;  %v336_v57 = vld [vmem:[%s2010_s9 + $0xf8] sm:$0xff] }
  0x24   : > { %1659 = vmatprep.subr.bf16.mxu0 %v1765_v9  ;;  %v352_v58 = vpack.c.bf16 %v336_v57, %v335_v56 }
  0x25   : > { %1716 = vmatpush3.bf16.msra.mxu1 %v1768_v24 }
  0x26   : > { %1628 = vmatmul.mubr.msk.bf16.gmra.mrb[4].mxu0 %vm392_vm0, %v340_v22  ;;  %1709 = vmatprep.subr.bf16.mxu1 %v1769_v29 }
  0x27   : > { %1631 = vmatprep.mubr.msk.bf16.mxu0 %vm392_vm0, %v341_v23  ;;  %1660 = vmatpush3.bf16.msra.mxu0 %v1765_v9 }
  0x28   : > { %1661 = vmatprep.subr.bf16.mxu0 %v1766_v19 }
  0x29   : > { %1717 = vmatpush3.bf16.msra.mxu1 %v1769_v29 }
  0x2a   : > { %1710 = vmatprep.subr.bf16.mxu1 %v1770_v59 }
  0x2b   : > { %1662 = vmatpush3.bf16.msra.mxu0 %v1766_v19 }
  0x2c   : > { %1663 = vmatprep.subr.bf16.mxu0 %v1767_v21 }
  0x2d   : > { %1718 = vmatpush3.bf16.msra.mxu1 %v1770_v59 }
  0x2e   : > { %1632 = vmatmul.mubr.msk.bf16.gmra.mrb[8].mxu0 %vm392_vm0, %v342_v30 }
  0x2f   : > { %1635 = vmatprep.mubr.msk.bf16.mxu0 %vm392_vm0, %v343_v31  ;;  %1664 = vmatpush3.bf16.msra.mxu0 %v1767_v21 }
  0x30   : > { %1665 = vmatprep.subr.bf16.mxu0 %v1768_v24 }
  0x33   : > { %1666 = vmatpush3.bf16.msra.mxu0 %v1768_v24 }
  0x34   : > { %1667 = vmatprep.subr.bf16.mxu0 %v1769_v29 }
  0x36   : > { %1636 = vmatmul.mubr.msk.bf16.gmra.mrb[12].mxu0 %vm392_vm0, %v344_v36 }
  0x37   : > { %1639 = vmatprep.mubr.msk.bf16.mxu0 %vm392_vm0, %v345_v37  ;;  %1668 = vmatpush3.bf16.msra.mxu0 %v1769_v29 }
  0x38   : > { %1669 = vmatprep.subr.bf16.mxu0 %v1770_v59 }
  0x3b   : > { %1670 = vmatpush3.bf16.msra.mxu0 %v1770_v59 }
  0x3e   : > { %1640 = vmatmul.mubr.msk.bf16.gmra.mrb[16].mxu0 %vm392_vm0, %v346_v42 }
  0x3f   : > { %1643 = vmatprep.mubr.msk.bf16.mxu0 %vm392_vm0, %v347_v43 }
  0x46   : > { %1644 = vmatmul.mubr.msk.bf16.gmra.mrb[20].mxu0 %vm392_vm0, %v348_v48 }
  0x47   : > { %1647 = vmatprep.mubr.msk.bf16.mxu0 %vm392_vm0, %v349_v49 }
  0x4e   : > { %1648 = vmatmul.mubr.msk.bf16.gmra.mrb[24].mxu0 %vm392_vm0, %v350_v54 }
  0x4f   : > { %1651 = vmatprep.mubr.msk.bf16.mxu0 %vm392_vm0, %v351_v55 }
  0x56   : > { %1652 = vmatmul.mubr.msk.bf16.gmra.mrb[28].mxu0 %vm392_vm0, %v352_v58 }
  0xf1   : > { %v1625_v61 = vpop.f32.mrb[0].mxu0 }
  0xf2   : > { %v484_v62 = vadd.f32 %v1625_v61, %v2087_v60  ;;  %v475_v63 = vpop.f32.mrb[1].mxu0 }
  0xf3   : > { %v476_v0 = vadd.f32 %v2087_v60, %v475_v63  ;;  %v1626_v1 = vpop.f32.mrb[2].mxu0 }
  0xf4   : > { %v487_v2 = vadd.f32 %v1626_v1, %v2087_v60  ;;  %v478_v3 = vpop.f32.mrb[3].mxu0  ;;  %v604_v5 = vmax.f32 %v484_v62, 0.0 }
  0xf5   : > { %v479_v4 = vadd.f32 %v2087_v60, %v478_v3  ;;  %v602_v7 = vmax.f32 %v476_v0, 0.0 }
  0xf6   : > { %v605_v6 = vmax.f32 %v487_v2, 0.0 }
  0xf7   : > { %v603_v8 = vmax.f32 %v479_v4, 0.0 }
  0xf8   : > { %v635_v9 = vpack.c.bf16 %v605_v6, %v604_v5 }
  0xf9   : > { %v634_v10 = vpack.c.bf16 %v603_v8, %v602_v7  ;;  %v1629_v11 = vpop.f32.mrb[4].mxu0 }
  0xfa   : > { %v500_v12 = vadd.f32 %v1629_v11, %v2087_v60  ;;  %v491_v13 = vpop.f32.mrb[5].mxu0 }
  0xfb   : > { %v492_v14 = vadd.f32 %v2087_v60, %v491_v13  ;;  %v1630_v15 = vpop.f32.mrb[6].mxu0  ;;  %1671 = vmatprep.mubr.bf16.mxu0 %v634_v10 }
  0xfc   : > { %v608_v16 = vmax.f32 %v500_v12, 0.0  ;;  %v503_v17 = vadd.f32 %v1630_v15, %v2087_v60  ;;  %v494_v18 = vpop.f32.mrb[7].mxu0  ;;  %1672 = vmatmul.mubr.bf16.vlgmr.msra.gmra.mrb[32].mxu0 %v635_v9 }
  0xfd   : > { %v606_v19 = vmax.f32 %v492_v14, 0.0  ;;  %v495_v20 = vadd.f32 %v2087_v60, %v494_v18 }
  0xfe   : > { %v609_v21 = vmax.f32 %v503_v17, 0.0 }
  0xff   : > { %v607_v22 = vmax.f32 %v495_v20, 0.0 }
 0x100   : > { %v637_v23 = vpack.c.bf16 %v609_v21, %v608_v16 }
 0x101   : > { %v636_v24 = vpack.c.bf16 %v607_v22, %v606_v19  ;;  %v1633_v25 = vpop.f32.mrb[8].mxu0 }
 0x102   : > { %v516_v26 = vadd.f32 %v1633_v25, %v2087_v60  ;;  %v507_v27 = vpop.f32.mrb[9].mxu0 }
 0x103   : > { %1675 = vmatprep.mubr.bf16.mxu1 %v636_v24  ;;  %v508_v28 = vadd.f32 %v2087_v60, %v507_v27  ;;  %v1634_v29 = vpop.f32.mrb[10].mxu0 }
 0x104   : > { %1676 = vmatmul.mubr.bf16.vlgmr.msra.gmra.mrb[0].mxu1 %v637_v23  ;;  %v612_v30 = vmax.f32 %v516_v26, 0.0  ;;  %v519_v31 = vadd.f32 %v1634_v29, %v2087_v60  ;;  %v510_v32 = vpop.f32.mrb[11].mxu0 }
 0x105   : > { %v610_v33 = vmax.f32 %v508_v28, 0.0  ;;  %v511_v34 = vadd.f32 %v2087_v60, %v510_v32 }
 0x106   : > { %v613_v35 = vmax.f32 %v519_v31, 0.0 }
 0x107   : > { %v611_v36 = vmax.f32 %v511_v34, 0.0 }
 0x108   : > { %v639_v37 = vpack.c.bf16 %v613_v35, %v612_v30 }
 0x109   : > { %v638_v38 = vpack.c.bf16 %v611_v36, %v610_v33  ;;  %v1637_v39 = vpop.f32.mrb[12].mxu0 }
 0x10a   : > { %v532_v40 = vadd.f32 %v1637_v39, %v2087_v60  ;;  %v523_v41 = vpop.f32.mrb[13].mxu0 }
 0x10b   : > { %1679 = vmatprep.mubr.bf16.mxu1 %v638_v38  ;;  %v524_v42 = vadd.f32 %v2087_v60, %v523_v41  ;;  %v1638_v43 = vpop.f32.mrb[14].mxu0 }
 0x10c   : > { %1680 = vmatmul.mubr.bf16.gmra.mrb[4].mxu1 %v639_v37  ;;  %v616_v44 = vmax.f32 %v532_v40, 0.0  ;;  %v535_v45 = vadd.f32 %v1638_v43, %v2087_v60  ;;  %v526_v46 = vpop.f32.mrb[15].mxu0 }
 0x10d   : > { %v614_v47 = vmax.f32 %v524_v42, 0.0  ;;  %v527_v48 = vadd.f32 %v2087_v60, %v526_v46  ;;  %v2124_v46 = vld [vmem:[%s2668_s4] ss:$0 sm:$0xff] }
 0x10e   : > { %v617_v49 = vmax.f32 %v535_v45, 0.0 }
 0x10f   : > { %v615_v50 = vmax.f32 %v527_v48, 0.0 }
 0x110   : > { %v641_v51 = vpack.c.bf16 %v617_v49, %v616_v44 }
 0x111   : > { %v640_v52 = vpack.c.bf16 %v615_v50, %v614_v47  ;;  %v1641_v53 = vpop.f32.mrb[16].mxu0 }
 0x112   : > { %v548_v54 = vadd.f32 %v1641_v53, %v2087_v60  ;;  %v539_v55 = vpop.f32.mrb[17].mxu0 }
 0x113   : > { %1683 = vmatprep.mubr.bf16.mxu1 %v640_v52  ;;  %v540_v56 = vadd.f32 %v2087_v60, %v539_v55  ;;  %v1642_v57 = vpop.f32.mrb[18].mxu0 }
 0x114   : > { %1684 = vmatmul.mubr.bf16.gmra.mrb[8].mxu1 %v641_v51  ;;  %v620_v58 = vmax.f32 %v548_v54, 0.0  ;;  %v551_v59 = vadd.f32 %v1642_v57, %v2087_v60  ;;  %v542_v61 = vpop.f32.mrb[19].mxu0 }
 0x115   : > { %v618_v62 = vmax.f32 %v540_v56, 0.0  ;;  %v543_v63 = vadd.f32 %v2087_v60, %v542_v61 }
 0x116   : > { %v621_v0 = vmax.f32 %v551_v59, 0.0 }
 0x117   : > { %v619_v1 = vmax.f32 %v543_v63, 0.0 }
 0x118   : > { %v643_v2 = vpack.c.bf16 %v621_v0, %v620_v58 }
 0x119   : > { %v642_v3 = vpack.c.bf16 %v619_v1, %v618_v62  ;;  %v1645_v4 = vpop.f32.mrb[20].mxu0 }
 0x11a   : > { %v564_v5 = vadd.f32 %v1645_v4, %v2087_v60  ;;  %v555_v6 = vpop.f32.mrb[21].mxu0 }
 0x11b   : > { %1687 = vmatprep.mubr.bf16.mxu1 %v642_v3  ;;  %v556_v7 = vadd.f32 %v2087_v60, %v555_v6  ;;  %v1646_v8 = vpop.f32.mrb[22].mxu0 }
 0x11c   : > { %1688 = vmatmul.mubr.bf16.gmra.mrb[12].mxu1 %v643_v2  ;;  %v624_v9 = vmax.f32 %v564_v5, 0.0  ;;  %v567_v10 = vadd.f32 %v1646_v8, %v2087_v60  ;;  %v558_v11 = vpop.f32.mrb[23].mxu0 }
 0x11d   : > { %v622_v12 = vmax.f32 %v556_v7, 0.0  ;;  %v559_v13 = vadd.f32 %v2087_v60, %v558_v11 }
 0x11e   : > { %v625_v14 = vmax.f32 %v567_v10, 0.0 }
 0x11f   : > { %v623_v15 = vmax.f32 %v559_v13, 0.0 }
 0x120   : > { %v645_v16 = vpack.c.bf16 %v625_v14, %v624_v9 }
 0x121   : > { %v644_v17 = vpack.c.bf16 %v623_v15, %v622_v12  ;;  %v1649_v18 = vpop.f32.mrb[24].mxu0 }
 0x122   : > { %v580_v19 = vadd.f32 %v1649_v18, %v2087_v60  ;;  %v571_v20 = vpop.f32.mrb[25].mxu0 }
 0x123   : > { %1691 = vmatprep.mubr.bf16.mxu1 %v644_v17  ;;  %v572_v21 = vadd.f32 %v2087_v60, %v571_v20  ;;  %v1650_v22 = vpop.f32.mrb[26].mxu0 }
 0x124   : > { %1692 = vmatmul.mubr.bf16.gmra.mrb[16].mxu1 %v645_v16  ;;  %v628_v23 = vmax.f32 %v580_v19, 0.0  ;;  %v583_v24 = vadd.f32 %v1650_v22, %v2087_v60  ;;  %v574_v25 = vpop.f32.mrb[27].mxu0 }
 0x125   : > { %v626_v26 = vmax.f32 %v572_v21, 0.0  ;;  %v575_v27 = vadd.f32 %v2087_v60, %v574_v25 }
 0x126   : > { %v629_v28 = vmax.f32 %v583_v24, 0.0 }
 0x127   : > { %v627_v29 = vmax.f32 %v575_v27, 0.0 }
 0x128   : > { %v647_v30 = vpack.c.bf16 %v629_v28, %v628_v23 }
 0x129   : > { %v646_v31 = vpack.c.bf16 %v627_v29, %v626_v26  ;;  %v1653_v32 = vpop.f32.mrb[28].mxu0 }
 0x12a   : > { %v596_v33 = vadd.f32 %v1653_v32, %v2087_v60  ;;  %v587_v34 = vpop.f32.mrb[29].mxu0 }
 0x12b   : > { %1695 = vmatprep.mubr.bf16.mxu1 %v646_v31  ;;  %v588_v35 = vadd.f32 %v2087_v60, %v587_v34  ;;  %v1654_v36 = vpop.f32.mrb[30].mxu0 }
 0x12c   : > { %1696 = vmatmul.mubr.bf16.gmra.mrb[20].mxu1 %v647_v30  ;;  %v632_v37 = vmax.f32 %v596_v33, 0.0  ;;  %v599_v38 = vadd.f32 %v1654_v36, %v2087_v60  ;;  %v590_v39 = vpop.f32.mrb[31].mxu0 }
 0x12d   : > { %v630_v40 = vmax.f32 %v588_v35, 0.0  ;;  %v591_v41 = vadd.f32 %v2087_v60, %v590_v39 }
 0x12e   : > { %v633_v42 = vmax.f32 %v599_v38, 0.0 }
 0x12f   : > { %v631_v43 = vmax.f32 %v591_v41, 0.0 }
 0x130   : > { %v649_v44 = vpack.c.bf16 %v633_v42, %v632_v37 }
 0x131   : > { %v648_v45 = vpack.c.bf16 %v631_v43, %v630_v40 }
 0x133   : > { %1699 = vmatprep.mubr.bf16.mxu1 %v648_v45 }
 0x134   : > { %1700 = vmatmul.mubr.bf16.gmra.mrb[24].mxu1 %v649_v44 }
 0x1cf   : > { %v1673_v47 = vpop.f32.mrb[32].mxu0 }
 0x1d0   : > { %v2127_v48 = vadd.f32 %v1673_v47, %v2124_v46  ;;  %v755_v49 = vpop.f32.mrb[33].mxu0 }
 0x1d1   : > { %v2130_v50 = vadd.f32 %v2124_v46, %v755_v49  ;;  %v1674_v60 = vpop.f32.mrb[34].mxu0 }
 0x1d2   : > { %886 = vadd.xlane.f32.xlu1 %v2127_v48  ;;  %v758_v51 = vpop.f32.mrb[35].mxu0  ;;  %v2135_v52 = vadd.f32 %v1674_v60, %v2124_v46  ;;  %v980_v53 = vmul.f32 %v2127_v48, %v2127_v48 }
 0x1d3   : > { %882 = vadd.xlane.f32.xlu0 %v2130_v50  ;;  %v2141_v55 = vadd.f32 %v2124_v46, %v758_v51  ;;  %v978_v62 = vmul.f32 %v2130_v50, %v2130_v50 }
 0x1d4   : > { %v981_v57 = vmul.f32 %v2135_v52, %v2135_v52 }
 0x1d5   : > { %v979_v61 = vmul.f32 %v2141_v55, %v2141_v55 }
 0x1d6   : > { %888 = vadd.xlane.f32.xlu1 %v2135_v52 }
 0x1d7   : > { %v1677_v54 = vpop.f32.mrb[0].mxu1  ;;  %1014 = vadd.xlane.f32.xlu0 %v980_v53 }
 0x1d8   : > { %v771_v56 = vpop.f32.mrb[1].mxu1  ;;  %v2154_v2 = vadd.f32 %v1677_v54, %v2124_v46 }
 0x1d9   : > { %v1678_v58 = vpop.f32.mrb[2].mxu1  ;;  %v2162_v6 = vadd.f32 %v2124_v46, %v771_v56 }
 0x1da   : > { %v774_v59 = vpop.f32.mrb[3].mxu1  ;;  %1016 = vadd.xlane.f32.xlu1 %v981_v57  ;;  %v2151_v0 = vadd.f32 %v1678_v58, %v2124_v46  ;;  %v984_v10 = vmul.f32 %v2154_v2, %v2154_v2 }
 0x1db   : > { %884 = vadd.xlane.f32.xlu0 %v2141_v55  ;;  %v2159_v5 = vadd.f32 %v2124_v46, %v774_v59  ;;  %v982_v14 = vmul.f32 %v2162_v6, %v2162_v6 }
 0x1dc   : > { %v985_v8 = vmul.f32 %v2151_v0, %v2151_v0 }
 0x1dd   : > { %v983_v13 = vmul.f32 %v2159_v5, %v2159_v5 }
 0x1de   : > { %1012 = vadd.xlane.f32.xlu1 %v979_v61 }
 0x1df   : > { %1010 = vadd.xlane.f32.xlu0 %v978_v62  ;;  %v1681_v63 = vpop.f32.mrb[4].mxu1 }
 0x1e0   : > { %v787_v1 = vpop.f32.mrb[5].mxu1  ;;  %v2181_v19 = vadd.f32 %v1681_v63, %v2124_v46 }
 0x1e1   : > { %v1682_v3 = vpop.f32.mrb[6].mxu1  ;;  %v2198_v26 = vadd.f32 %v2124_v46, %v787_v1 }
 0x1e2   : > { %896 = vadd.xlane.f32.xlu1 %v2151_v0  ;;  %v790_v4 = vpop.f32.mrb[7].mxu1  ;;  %v2175_v16 = vadd.f32 %v1682_v3, %v2124_v46  ;;  %v988_v31 = vmul.f32 %v2181_v19, %v2181_v19 }
 0x1e3   : > { %894 = vadd.xlane.f32.xlu0 %v2154_v2  ;;  %v2195_v25 = vadd.f32 %v2124_v46, %v790_v4  ;;  %v986_v38 = vmul.f32 %v2198_v26, %v2198_v26 }
 0x1e4   : > { %v989_v28 = vmul.f32 %v2175_v16, %v2175_v16 }
 0x1e5   : > { %v987_v37 = vmul.f32 %v2195_v25, %v2195_v25 }
 0x1e6   : > { %892 = vadd.xlane.f32.xlu1 %v2159_v5 }
 0x1e7   : > { %890 = vadd.xlane.f32.xlu0 %v2162_v6  ;;  %v1685_v7 = vpop.f32.mrb[8].mxu1 }
 0x1e8   : > { %v803_v9 = vpop.f32.mrb[9].mxu1  ;;  %v2230_v43 = vadd.f32 %v1685_v7, %v2124_v46 }
 0x1e9   : > { %v1686_v11 = vpop.f32.mrb[10].mxu1  ;;  %v2247_v53 = vadd.f32 %v2124_v46, %v803_v9 }
 0x1ea   : > { %1024 = vadd.xlane.f32.xlu1 %v985_v8  ;;  %v806_v12 = vpop.f32.mrb[11].mxu1  ;;  %v2224_v40 = vadd.f32 %v1686_v11, %v2124_v46  ;;  %v992_v59 = vmul.f32 %v2230_v43, %v2230_v43 }
 0x1eb   : > { %1022 = vadd.xlane.f32.xlu0 %v984_v10  ;;  %v2244_v51 = vadd.f32 %v2124_v46, %v806_v12  ;;  %v990_v7 = vmul.f32 %v2247_v53, %v2247_v53 }
 0x1ec   : > { %v993_v56 = vmul.f32 %v2224_v40, %v2224_v40 }
 0x1ed   : > { %v991_v4 = vmul.f32 %v2244_v51, %v2244_v51 }
 0x1ee   : > { %1020 = vadd.xlane.f32.xlu1 %v983_v13 }
 0x1ef   : > { %1018 = vadd.xlane.f32.xlu0 %v982_v14  ;;  %v1689_v15 = vpop.f32.mrb[12].mxu1 }
 0x1f0   : > { %v2178_v17 = vadd.f32 %v1689_v15, %v2124_v46  ;;  %v819_v18 = vpop.f32.mrb[13].mxu1 }
 0x1f1   : > { %v2184_v20 = vadd.f32 %v2124_v46, %v819_v18  ;;  %v1690_v21 = vpop.f32.mrb[14].mxu1 }
 0x1f2   : > { %904 = vadd.xlane.f32.xlu1 %v2175_v16  ;;  %v2188_v22 = vadd.f32 %v1690_v21, %v2124_v46  ;;  %v822_v23 = vpop.f32.mrb[15].mxu1  ;;  %v996_v8 = vmul.f32 %v2178_v17, %v2178_v17 }
 0x1f3   : > { %902 = vadd.xlane.f32.xlu0 %v2181_v19  ;;  %v2192_v24 = vadd.f32 %v2124_v46, %v822_v23  ;;  %v994_v10 = vmul.f32 %v2184_v20, %v2184_v20 }
 0x1f5   : > { %v995_v9 = vmul.f32 %v2192_v24, %v2192_v24 }
 0x1f6   : > { %900 = vadd.xlane.f32.xlu1 %v2195_v25 }
 0x1f7   : > { %898 = vadd.xlane.f32.xlu0 %v2198_v26  ;;  %v1693_v27 = vpop.f32.mrb[16].mxu1 }
 0x1f8   : > { %v2205_v29 = vadd.f32 %v1693_v27, %v2124_v46  ;;  %v835_v30 = vpop.f32.mrb[17].mxu1 }
 0x1f9   : > { %v2210_v32 = vadd.f32 %v2124_v46, %v835_v30  ;;  %v1694_v33 = vpop.f32.mrb[18].mxu1 }
 0x1fa   : > { %1032 = vadd.xlane.f32.xlu1 %v989_v28  ;;  %v2213_v34 = vadd.f32 %v1694_v33, %v2124_v46  ;;  %v838_v35 = vpop.f32.mrb[19].mxu1  ;;  %v1000_v12 = vmul.f32 %v2205_v29, %v2205_v29 }
 0x1fb   : > { %1030 = vadd.xlane.f32.xlu0 %v988_v31  ;;  %v2216_v36 = vadd.f32 %v2124_v46, %v838_v35  ;;  %v998_v14 = vmul.f32 %v2210_v32, %v2210_v32 }
 0x1fc   : > { %v1001_v11 = vmul.f32 %v2213_v34, %v2213_v34 }
 0x1fd   : > { %v999_v13 = vmul.f32 %v2216_v36, %v2216_v36 }
 0x1fe   : > { %1028 = vadd.xlane.f32.xlu1 %v987_v37 }
 0x1ff   : > { %1026 = vadd.xlane.f32.xlu0 %v986_v38  ;;  %v1697_v39 = vpop.f32.mrb[20].mxu1 }
 0x200   : > { %v2227_v41 = vadd.f32 %v1697_v39, %v2124_v46  ;;  %v851_v42 = vpop.f32.mrb[21].mxu1 }
 0x201   : > { %v2233_v44 = vadd.f32 %v2124_v46, %v851_v42  ;;  %v1698_v45 = vpop.f32.mrb[22].mxu1 }
 0x202   : > { %912 = vadd.xlane.f32.xlu1 %v2224_v40  ;;  %v2237_v47 = vadd.f32 %v1698_v45, %v2124_v46  ;;  %v854_v49 = vpop.f32.mrb[23].mxu1  ;;  %v1004_v18 = vmul.f32 %v2227_v41, %v2227_v41 }
 0x203   : > { %910 = vadd.xlane.f32.xlu0 %v2230_v43  ;;  %v2241_v60 = vadd.f32 %v2124_v46, %v854_v49  ;;  %v1002_v23 = vmul.f32 %v2233_v44, %v2233_v44 }
 0x204   : > { %v1005_v15 = vmul.f32 %v2237_v47, %v2237_v47 }
 0x205   : > { %v1003_v21 = vmul.f32 %v2241_v60, %v2241_v60 }
 0x206   : > { %908 = vadd.xlane.f32.xlu1 %v2244_v51 }
 0x207   : > { %906 = vadd.xlane.f32.xlu0 %v2247_v53  ;;  %v1701_v54 = vpop.f32.mrb[24].mxu1 }
 0x208   : > { %v2254_v57 = vadd.f32 %v1701_v54, %v2124_v46  ;;  %v867_v58 = vpop.f32.mrb[25].mxu1 }
 0x209   : > { %v2259_v61 = vadd.f32 %v2124_v46, %v867_v58  ;;  %v1702_v62 = vpop.f32.mrb[26].mxu1 }
 0x20a   : > { %1040 = vadd.xlane.f32.xlu1 %v993_v56  ;;  %v2262_v63 = vadd.f32 %v1702_v62, %v2124_v46  ;;  %v870_v1 = vpop.f32.mrb[27].mxu1  ;;  %v1008_v31 = vmul.f32 %v2254_v57, %v2254_v57 }
 0x20b   : > { %1038 = vadd.xlane.f32.xlu0 %v992_v59  ;;  %v2265_v3 = vadd.f32 %v2124_v46, %v870_v1  ;;  %v997_v46 = vmul.f32 %v2188_v22, %v2188_v22  ;;  %v1006_v28 = vmul.f32 %v2259_v61, %v2259_v61 }
 0x20c   : > { %v1009_v30 = vmul.f32 %v2262_v63, %v2262_v63 }
 0x20d   : > { %v1007_v27 = vmul.f32 %v2265_v3, %v2265_v3 }
 0x20e   : > { %1036 = vadd.xlane.f32.xlu1 %v991_v4 }
 0x20f   : > { %1034 = vadd.xlane.f32.xlu0 %v990_v7 }
 0x212   : > { %920 = vadd.xlane.f32.xlu1 %v2188_v22 }
 0x213   : > { %918 = vadd.xlane.f32.xlu0 %v2178_v17 }
 0x216   : > { %916 = vadd.xlane.f32.xlu1 %v2192_v24 }
 0x217   : > { %914 = vadd.xlane.f32.xlu0 %v2184_v20 }
 0x21a   : > { %1048 = vadd.xlane.f32.xlu1 %v997_v46 }
 0x21b   : > { %1046 = vadd.xlane.f32.xlu0 %v996_v8 }
 0x21e   : > { %1044 = vadd.xlane.f32.xlu1 %v995_v9 }
 0x21f   : > { %1042 = vadd.xlane.f32.xlu0 %v994_v10 }
 0x222   : > { %928 = vadd.xlane.f32.xlu1 %v2213_v34 }
 0x223   : > { %926 = vadd.xlane.f32.xlu0 %v2205_v29 }
 0x226   : > { %924 = vadd.xlane.f32.xlu1 %v2216_v36 }
 0x227   : > { %922 = vadd.xlane.f32.xlu0 %v2210_v32 }
 0x22a   : > { %1056 = vadd.xlane.f32.xlu1 %v1001_v11 }
 0x22b   : > { %1054 = vadd.xlane.f32.xlu0 %v1000_v12 }
 0x22e   : > { %1052 = vadd.xlane.f32.xlu1 %v999_v13 }
 0x22f   : > { %1050 = vadd.xlane.f32.xlu0 %v998_v14 }
 0x232   : > { %936 = vadd.xlane.f32.xlu1 %v2237_v47 }
 0x233   : > { %934 = vadd.xlane.f32.xlu0 %v2227_v41 }
 0x236   : > { %932 = vadd.xlane.f32.xlu1 %v2241_v60 }
 0x237   : > { %930 = vadd.xlane.f32.xlu0 %v2233_v44 }
 0x23a   : > { %1064 = vadd.xlane.f32.xlu1 %v1005_v15 }
 0x23b   : > { %1062 = vadd.xlane.f32.xlu0 %v1004_v18 }
 0x23e   : > { %1060 = vadd.xlane.f32.xlu1 %v1003_v21 }
 0x23f   : > { %1058 = vadd.xlane.f32.xlu0 %v1002_v23 }
 0x242   : > { %944 = vadd.xlane.f32.xlu1 %v2262_v63 }
 0x243   : > { %942 = vadd.xlane.f32.xlu0 %v2254_v57 }
 0x246   : > { %940 = vadd.xlane.f32.xlu1 %v2265_v3 }
 0x247   : > { %938 = vadd.xlane.f32.xlu0 %v2259_v61 }
 0x24a   : > { %1068 = vadd.xlane.f32.xlu1 %v1007_v27 }
 0x24b   : > { %1066 = vadd.xlane.f32.xlu0 %v1006_v28 }
 0x24e   : > { %1072 = vadd.xlane.f32.xlu1 %v1009_v30 }
 0x24f   : > { %1070 = vadd.xlane.f32.xlu0 %v1008_v31 }
 0x25f   : > { %v887_v33 = vpop.xlane.xlu1 %886 }
 0x260   : > { %v883_v35 = vpop.xlane.xlu0 %882  ;;  %v948_v37 = vmul.f32 0.0078125, %v887_v33 }
 0x261   : > { %v2319_v1 = vmul.f32 0.0078125, %v883_v35 }
 0x262   : > { %v1108_v45 = vmul.f32 %v948_v37, %v948_v37 }
 0x263   : > { %v889_v38 = vpop.xlane.xlu1 %888  ;;  %v1106_v14 = vmul.f32 %v2319_v1, %v2319_v1 }
 0x264   : > { %v949_v39 = vmul.f32 0.0078125, %v889_v38  ;;  %v1015_v42 = vpop.xlane.xlu0 %1014 }
 0x265   : > { %v1076_v49 = vmul.f32 0.0078125, %v1015_v42 }
 0x266   : > { %v1109_v58 = vmul.f32 %v949_v39, %v949_v39 }
 0x267   : > { %v1140_v54 = vsub.f32 %v1076_v49, %v1108_v45  ;;  %v1017_v56 = vpop.xlane.xlu1 %1016 }
 0x268   : > { %v1077_v59 = vmul.f32 0.0078125, %v1017_v56  ;;  %v885_v62 = vpop.xlane.xlu0 %884 }
 0x269   : > { %v1172_v4 = vmax.f32 %v1140_v54, 0.0  ;;  %v2321_v7 = vmul.f32 0.0078125, %v885_v62  ;;  %v1204_v54 = vsub.f32 %v2127_v48, %v948_v37  ;;  %v2347_v48 = vld [vmem:[%s2670_s6] ss:$0 sm:$0xff] }
 0x26a   : > { %v1141_v46 = vsub.f32 %v1077_v59, %v1109_v58  ;;  %v2335_v58 = vld [vmem:[%s2669_s5] ss:$0 sm:$0xff] }
 0x26b   : > { %v1236_v8 = vadd.f32 1e-05, %v1172_v4  ;;  %v1107_v9 = vmul.f32 %v2321_v7, %v2321_v7  ;;  %v1013_v10 = vpop.xlane.xlu1 %1012 }
 0x26c   : > { %v1173_v11 = vmax.f32 %v1141_v46, 0.0  ;;  %v1075_v12 = vmul.f32 0.0078125, %v1013_v10  ;;  %v1011_v13 = vpop.xlane.xlu0 %1010  ;;  %v1205_v10 = vsub.f32 %v2135_v52, %v949_v39 }
 0x26d   : > { %1771 = vrsqrt.f32 %v1236_v8  ;;  %v1074_v15 = vmul.f32 0.0078125, %v1011_v13 }
 0x26e   : > { %v1237_v18 = vadd.f32 1e-05, %v1173_v11  ;;  %v1139_v21 = vsub.f32 %v1075_v12, %v1107_v9 }
 0x26f   : > { %v1138_v23 = vsub.f32 %v1074_v15, %v1106_v14  ;;  %v897_v27 = vpop.xlane.xlu1 %896 }
 0x270   : > { %1773 = vrsqrt.f32 %v1237_v18  ;;  %v1171_v28 = vmax.f32 %v1139_v21, 0.0  ;;  %v895_v30 = vpop.xlane.xlu0 %894  ;;  %v2327_v42 = vmul.f32 0.0078125, %v897_v27  ;;  %v1203_v21 = vsub.f32 %v2141_v55, %v2321_v7 }
 0x271   : > { %v1170_v31 = vmax.f32 %v1138_v23, 0.0  ;;  %v2329_v49 = vmul.f32 0.0078125, %v895_v30  ;;  %v1202_v55 = vsub.f32 %v2130_v50, %v2319_v1 }
 0x272   : > { %v1235_v33 = vadd.f32 1e-05, %v1171_v28  ;;  %v1113_v4 = vmul.f32 %v2327_v42, %v2327_v42 }
 0x273   : > { %v1234_v35 = vadd.f32 1e-05, %v1170_v31  ;;  %v893_v38 = vpop.xlane.xlu1 %892  ;;  %v1112_v37 = vmul.f32 %v2329_v49, %v2329_v49 }
 0x274   : > { %1775 = vrsqrt.f32 %v1235_v33  ;;  %v891_v45 = vpop.xlane.xlu0 %890  ;;  %v2341_v46 = vmul.f32 0.0078125, %v893_v38 }
 0x275   : > { %1777 = vrsqrt.f32 %v1234_v35  ;;  %v2351_v11 = vmul.f32 0.0078125, %v891_v45 }
 0x276   : > { %v1111_v27 = vmul.f32 %v2341_v46, %v2341_v46 }
 0x277   : > { %v1772_v56 = vpop.eup %1771  ;;  %v1025_v59 = vpop.xlane.xlu1 %1024  ;;  %v1110_v35 = vmul.f32 %v2351_v11, %v2351_v11 }
 0x278   : > { %v1300_v62 = vmul.f32 %v1772_v56, %v1204_v54  ;;  %v1081_v8 = vmul.f32 0.0078125, %v1025_v59  ;;  %v1023_v9 = vpop.xlane.xlu0 %1022 }
 0x279   : > { %v1080_v12 = vmul.f32 0.0078125, %v1023_v9 }
 0x27a   : > { %v1774_v13 = vpop.eup %1773  ;;  %v1339_v14 = vmul.f32 %v2335_v58, %v1300_v62  ;;  %v1145_v15 = vsub.f32 %v1081_v8, %v1113_v4 }
 0x27b   : > { %v1301_v18 = vmul.f32 %v1774_v13, %v1205_v10  ;;  %v1144_v52 = vsub.f32 %v1080_v12, %v1112_v37  ;;  %v1021_v39 = vpop.xlane.xlu1 %1020 }
 0x27c   : > { %v1378_v23 = vadd.f32 %v2347_v48, %v1339_v14  ;;  %v1177_v28 = vmax.f32 %v1145_v15, 0.0  ;;  %v1079_v30 = vmul.f32 0.0078125, %v1021_v39  ;;  %v1019_v31 = vpop.xlane.xlu0 %1018 }
 0x27d   : > { %v1340_v33 = vmul.f32 %v2335_v58, %v1301_v18  ;;  %v1176_v38 = vmax.f32 %v1144_v52, 0.0  ;;  %v1078_v45 = vmul.f32 0.0078125, %v1019_v31 }
 0x27e   : > { %v1776_v54 = vpop.eup %1775  ;;  %1410 = vst [vmem:[%s2364_s14 + $0x10] sm:$0xff] %v1378_v23  ;;  %v1241_v7 = vadd.f32 1e-05, %v1177_v28  ;;  %v1143_v56 = vsub.f32 %v1079_v30, %v1111_v27 }
 0x27f   : > { %v1778_v59 = vpop.eup %1777  ;;  %v1379_v62 = vadd.f32 %v2347_v48, %v1340_v33  ;;  %v1299_v4 = vmul.f32 %v1776_v54, %v1203_v21  ;;  %v1240_v8 = vadd.f32 1e-05, %v1176_v38  ;;  %v1142_v9 = vsub.f32 %v1078_v45, %v1110_v35  ;;  %v905_v10 = vpop.xlane.xlu1 %904 }
 0x280   : > { %v1298_v37 = vmul.f32 %v1778_v59, %v1202_v55  ;;  %1779 = vrsqrt.f32 %v1241_v7  ;;  %v1175_v12 = vmax.f32 %v1143_v56, 0.0  ;;  %v903_v13 = vpop.xlane.xlu0 %902  ;;  %v2373_v23 = vmul.f32 0.0078125, %v905_v10 }
 0x281   : > { %1411 = vst [vmem:[%s2364_s14 + $0x18] sm:$0xff] %v1379_v62  ;;  %v1338_v50 = vmul.f32 %v2335_v58, %v1299_v4  ;;  %1781 = vrsqrt.f32 %v1240_v8  ;;  %v1174_v1 = vmax.f32 %v1142_v9, 0.0  ;;  %v2376_v28 = vmul.f32 0.0078125, %v903_v13 }
 0x282   : > { %v1337_v14 = vmul.f32 %v2335_v58, %v1298_v37  ;;  %v1239_v15 = vadd.f32 1e-05, %v1175_v12  ;;  %v1117_v31 = vmul.f32 %v2373_v23, %v2373_v23  ;;  %v1209_v45 = vsub.f32 %v2151_v0, %v2327_v42 }
 0x283   : > { %v1377_v18 = vadd.f32 %v2347_v48, %v1338_v50  ;;  %v1238_v21 = vadd.f32 1e-05, %v1174_v1  ;;  %v901_v52 = vpop.xlane.xlu1 %900  ;;  %v1116_v54 = vmul.f32 %v2376_v28, %v2376_v28  ;;  %v1208_v59 = vsub.f32 %v2154_v2, %v2329_v49 }
 0x284   : > { %v1376_v39 = vadd.f32 %v2347_v48, %v1337_v14  ;;  %1783 = vrsqrt.f32 %v1239_v15  ;;  %v899_v27 = vpop.xlane.xlu0 %898  ;;  %v2381_v33 = vmul.f32 0.0078125, %v901_v52  ;;  %v1207_v8 = vsub.f32 %v2159_v5, %v2341_v46 }
 0x285   : > { %1409 = vst [vmem:[%s2364_s14 + $0x8] sm:$0xff] %v1377_v18  ;;  %1785 = vrsqrt.f32 %v1238_v21  ;;  %v2387_v55 = vmul.f32 0.0078125, %v899_v27  ;;  %v1206_v5 = vsub.f32 %v2162_v6, %v2351_v11 }
 0x286   : > { %1408 = vst [vmem:[%s2364_s14] sm:$0xff] %v1376_v39  ;;  %v1115_v0 = vmul.f32 %v2381_v33, %v2381_v33 }
 0x287   : > { %v1033_v30 = vpop.xlane.xlu1 %1032  ;;  %v1114_v2 = vmul.f32 %v2387_v55, %v2387_v55 }
 0x288   : > { %v1085_v35 = vmul.f32 0.0078125, %v1033_v30  ;;  %v1031_v38 = vpop.xlane.xlu0 %1030 }
 0x289   : > { %v1084_v7 = vmul.f32 0.0078125, %v1031_v38 }
 0x28a   : > { %v1780_v56 = vpop.eup %1779  ;;  %v1149_v62 = vsub.f32 %v1085_v35, %v1117_v31 }
 0x28b   : > { %v1782_v4 = vpop.eup %1781  ;;  %v1305_v9 = vmul.f32 %v1780_v56, %v1209_v45  ;;  %v1148_v10 = vsub.f32 %v1084_v7, %v1116_v54  ;;  %v1029_v37 = vpop.xlane.xlu1 %1028 }
 0x28c   : > { %v1304_v12 = vmul.f32 %v1782_v4, %v1208_v59  ;;  %v1181_v42 = vmax.f32 %v1149_v62, 0.0  ;;  %v1083_v13 = vmul.f32 0.0078125, %v1029_v37  ;;  %v1027_v50 = vpop.xlane.xlu0 %1026 }
 0x28d   : > { %v1344_v1 = vmul.f32 %v2335_v58, %v1305_v9  ;;  %v1180_v49 = vmax.f32 %v1148_v10, 0.0  ;;  %v1082_v14 = vmul.f32 0.0078125, %v1027_v50 }
 0x28e   : > { %v1784_v15 = vpop.eup %1783  ;;  %v1343_v46 = vmul.f32 %v2335_v58, %v1304_v12  ;;  %v1245_v18 = vadd.f32 1e-05, %v1181_v42  ;;  %v1147_v21 = vsub.f32 %v1083_v13, %v1115_v0 }
 0x28f   : > { %v1786_v52 = vpop.eup %1785  ;;  %v1383_v39 = vadd.f32 %v2347_v48, %v1344_v1  ;;  %v1303_v27 = vmul.f32 %v1784_v15, %v1207_v8  ;;  %v1244_v30 = vadd.f32 1e-05, %v1180_v49  ;;  %v1146_v31 = vsub.f32 %v1082_v14, %v1114_v2  ;;  %v913_v35 = vpop.xlane.xlu1 %912 }
 0x290   : > { %v1382_v38 = vadd.f32 %v2347_v48, %v1343_v46  ;;  %v1302_v45 = vmul.f32 %v1786_v52, %v1206_v5  ;;  %1787 = vrsqrt.f32 %v1245_v18  ;;  %v1179_v54 = vmax.f32 %v1147_v21, 0.0  ;;  %v911_v7 = vpop.xlane.xlu0 %910 }
 0x291   : > { %1415 = vst [vmem:[%s2364_s14 + $0x38] sm:$0xff] %v1383_v39  ;;  %v1342_v6 = vmul.f32 %v2335_v58, %v1303_v27  ;;  %1789 = vrsqrt.f32 %v1244_v30  ;;  %v1178_v11 = vmax.f32 %v1146_v31, 0.0  ;;  %v2409_v10 = vmul.f32 0.0078125, %v913_v35 }
 0x292   : > { %1414 = vst [vmem:[%s2364_s14 + $0x30] sm:$0xff] %v1382_v38  ;;  %v1341_v56 = vmul.f32 %v2335_v58, %v1302_v45  ;;  %v1243_v59 = vadd.f32 1e-05, %v1179_v54  ;;  %v2412_v12 = vmul.f32 0.0078125, %v911_v7  ;;  %v1213_v2 = vsub.f32 %v2175_v16, %v2373_v23 }
 0x293   : > { %v1381_v62 = vadd.f32 %v2347_v48, %v1342_v6  ;;  %v1242_v4 = vadd.f32 1e-05, %v1178_v11  ;;  %v909_v8 = vpop.xlane.xlu1 %908  ;;  %v1121_v42 = vmul.f32 %v2409_v10, %v2409_v10  ;;  %v1212_v46 = vsub.f32 %v2181_v19, %v2376_v28 }
 0x294   : > { %v1380_v9 = vadd.f32 %v2347_v48, %v1341_v56  ;;  %1791 = vrsqrt.f32 %v1243_v59  ;;  %v907_v37 = vpop.xlane.xlu0 %906  ;;  %v2417_v13 = vmul.f32 0.0078125, %v909_v8  ;;  %v1120_v49 = vmul.f32 %v2412_v12, %v2412_v12 }
 0x295   : > { %1413 = vst [vmem:[%s2364_s14 + $0x28] sm:$0xff] %v1381_v62  ;;  %1793 = vrsqrt.f32 %v1242_v4  ;;  %v2423_v14 = vmul.f32 0.0078125, %v907_v37  ;;  %v1211_v52 = vsub.f32 %v2195_v25, %v2381_v33  ;;  %v1210_v25 = vsub.f32 %v2198_v26, %v2387_v55 }
 0x296   : > { %1412 = vst [vmem:[%s2364_s14 + $0x20] sm:$0xff] %v1380_v9  ;;  %v1119_v16 = vmul.f32 %v2417_v13, %v2417_v13 }
 0x297   : > { %v1041_v0 = vpop.xlane.xlu1 %1040  ;;  %v1118_v19 = vmul.f32 %v2423_v14, %v2423_v14 }
 0x298   : > { %v1089_v50 = vmul.f32 0.0078125, %v1041_v0  ;;  %v1039_v1 = vpop.xlane.xlu0 %1038 }
 0x299   : > { %v1088_v15 = vmul.f32 0.0078125, %v1039_v1 }
 0x29a   : > { %v1788_v5 = vpop.eup %1787  ;;  %v1153_v18 = vsub.f32 %v1089_v50, %v1121_v42 }
 0x29b   : > { %v1790_v21 = vpop.eup %1789  ;;  %v1309_v39 = vmul.f32 %v1788_v5, %v1213_v2  ;;  %v1152_v27 = vsub.f32 %v1088_v15, %v1120_v49  ;;  %v1037_v30 = vpop.xlane.xlu1 %1036 }
 0x29c   : > { %v1308_v31 = vmul.f32 %v1790_v21, %v1212_v46  ;;  %v1185_v23 = vmax.f32 %v1153_v18, 0.0  ;;  %v1087_v35 = vmul.f32 0.0078125, %v1037_v30  ;;  %v1035_v38 = vpop.xlane.xlu0 %1034 }
 0x29d   : > { %v1348_v45 = vmul.f32 %v2335_v58, %v1309_v39  ;;  %v1184_v28 = vmax.f32 %v1152_v27, 0.0  ;;  %v1086_v54 = vmul.f32 0.0078125, %v1035_v38 }
 0x29e   : > { %v1792_v7 = vpop.eup %1791  ;;  %v1347_v33 = vmul.f32 %v2335_v58, %v1308_v31  ;;  %v1249_v6 = vadd.f32 1e-05, %v1185_v23  ;;  %v1151_v11 = vsub.f32 %v1087_v35, %v1119_v16  ;;  %v1217_v23 = vsub.f32 %v2224_v40, %v2409_v10 }
 0x29f   : > { %v1794_v56 = vpop.eup %1793  ;;  %v1387_v59 = vadd.f32 %v2347_v48, %v1348_v45  ;;  %v1307_v62 = vmul.f32 %v1792_v7, %v1211_v52  ;;  %v1248_v4 = vadd.f32 1e-05, %v1184_v28  ;;  %v1150_v8 = vsub.f32 %v1086_v54, %v1118_v19  ;;  %v921_v9 = vpop.xlane.xlu1 %920 }
 0x2a0   : > { %v1386_v37 = vadd.f32 %v2347_v48, %v1347_v33  ;;  %v1306_v0 = vmul.f32 %v1794_v56, %v1210_v25  ;;  %1795 = vrsqrt.f32 %v1249_v6  ;;  %v1183_v42 = vmax.f32 %v1151_v11, 0.0  ;;  %v919_v50 = vpop.xlane.xlu0 %918 }
 0x2a1   : > { %1419 = vst [vmem:[%s2364_s14 + $0x58] sm:$0xff] %v1387_v59  ;;  %v1346_v26 = vmul.f32 %v2335_v58, %v1307_v62  ;;  %1797 = vrsqrt.f32 %v1248_v4  ;;  %v1182_v55 = vmax.f32 %v1150_v8, 0.0  ;;  %v2445_v18 = vmul.f32 0.0078125, %v921_v9 }
 0x2a2   : > { %1418 = vst [vmem:[%s2364_s14 + $0x50] sm:$0xff] %v1386_v37  ;;  %v1345_v1 = vmul.f32 %v2335_v58, %v1306_v0  ;;  %v1247_v2 = vadd.f32 1e-05, %v1183_v42  ;;  %v2448_v52 = vmul.f32 0.0078125, %v919_v50  ;;  %v1216_v28 = vsub.f32 %v2230_v43, %v2412_v12 }
 0x2a3   : > { %v1385_v49 = vadd.f32 %v2347_v48, %v1346_v26  ;;  %v1246_v15 = vadd.f32 1e-05, %v1182_v55  ;;  %v917_v5 = vpop.xlane.xlu1 %916  ;;  %v1125_v27 = vmul.f32 %v2445_v18, %v2445_v18  ;;  %v1215_v25 = vsub.f32 %v2244_v51, %v2417_v13 }
 0x2a4   : > { %v1384_v46 = vadd.f32 %v2347_v48, %v1345_v1  ;;  %1799 = vrsqrt.f32 %v1247_v2  ;;  %v915_v21 = vpop.xlane.xlu0 %914  ;;  %v2453_v30 = vmul.f32 0.0078125, %v917_v5  ;;  %v1124_v35 = vmul.f32 %v2448_v52, %v2448_v52 }
 0x2a5   : > { %1417 = vst [vmem:[%s2364_s14 + $0x48] sm:$0xff] %v1385_v49  ;;  %1801 = vrsqrt.f32 %v1246_v15  ;;  %v2459_v38 = vmul.f32 0.0078125, %v915_v21  ;;  %v1214_v51 = vsub.f32 %v2247_v53, %v2423_v14 }
 0x2a6   : > { %1416 = vst [vmem:[%s2364_s14 + $0x40] sm:$0xff] %v1384_v46  ;;  %v1123_v40 = vmul.f32 %v2453_v30, %v2453_v30 }
 0x2a7   : > { %v1049_v39 = vpop.xlane.xlu1 %1048  ;;  %v1122_v43 = vmul.f32 %v2459_v38, %v2459_v38 }
 0x2a8   : > { %v1093_v31 = vmul.f32 0.0078125, %v1049_v39  ;;  %v1047_v16 = vpop.xlane.xlu0 %1046 }
 0x2a9   : > { %v1092_v45 = vmul.f32 0.0078125, %v1047_v16 }
 0x2aa   : > { %v1796_v19 = vpop.eup %1795  ;;  %v1157_v54 = vsub.f32 %v1093_v31, %v1125_v27 }
 0x2ab   : > { %v1798_v7 = vpop.eup %1797  ;;  %v1313_v33 = vmul.f32 %v1796_v19, %v1217_v23  ;;  %v1156_v6 = vsub.f32 %v1092_v45, %v1124_v35  ;;  %v1045_v11 = vpop.xlane.xlu1 %1044 }
 0x2ac   : > { %v1312_v56 = vmul.f32 %v1798_v7, %v1216_v28  ;;  %v1189_v10 = vmax.f32 %v1157_v54, 0.0  ;;  %v1091_v59 = vmul.f32 0.0078125, %v1045_v11  ;;  %v1043_v62 = vpop.xlane.xlu0 %1042 }
 0x2ad   : > { %v1352_v4 = vmul.f32 %v2335_v58, %v1313_v33  ;;  %v1188_v12 = vmax.f32 %v1156_v6, 0.0  ;;  %v1090_v8 = vmul.f32 0.0078125, %v1043_v62  ;;  %v1221_v6 = vsub.f32 %v2188_v22, %v2445_v18 }
 0x2ae   : > { %v1800_v9 = vpop.eup %1799  ;;  %v1351_v13 = vmul.f32 %v2335_v58, %v1312_v56  ;;  %v1253_v37 = vadd.f32 1e-05, %v1189_v10  ;;  %v1155_v0 = vsub.f32 %v1091_v59, %v1123_v40  ;;  %v1220_v59 = vsub.f32 %v2178_v17, %v2448_v52 }
 0x2af   : > { %v1802_v42 = vpop.eup %1801  ;;  %v1391_v50 = vadd.f32 %v2347_v48, %v1352_v4  ;;  %v1311_v26 = vmul.f32 %v1800_v9, %v1215_v25  ;;  %v1252_v55 = vadd.f32 1e-05, %v1188_v12  ;;  %v1154_v1 = vsub.f32 %v1090_v8, %v1122_v43  ;;  %v929_v2 = vpop.xlane.xlu1 %928 }
 0x2b0   : > { %v1390_v49 = vadd.f32 %v2347_v48, %v1351_v13  ;;  %v1310_v15 = vmul.f32 %v1802_v42, %v1214_v51  ;;  %1803 = vrsqrt.f32 %v1253_v37  ;;  %v1187_v5 = vmax.f32 %v1155_v0, 0.0  ;;  %v927_v46 = vpop.xlane.xlu0 %926 }
 0x2b1   : > { %1423 = vst [vmem:[%s2364_s14 + $0x78] sm:$0xff] %v1391_v50  ;;  %v1350_v53 = vmul.f32 %v2335_v58, %v1311_v26  ;;  %1805 = vrsqrt.f32 %v1252_v55  ;;  %v1186_v14 = vmax.f32 %v1154_v1, 0.0  ;;  %v2481_v35 = vmul.f32 0.0078125, %v929_v2 }
 0x2b2   : > { %1422 = vst [vmem:[%s2364_s14 + $0x70] sm:$0xff] %v1390_v49  ;;  %v1349_v21 = vmul.f32 %v2335_v58, %v1310_v15  ;;  %v1251_v39 = vadd.f32 1e-05, %v1187_v5  ;;  %v2484_v19 = vmul.f32 0.0078125, %v927_v46  ;;  %v1219_v43 = vsub.f32 %v2192_v24, %v2453_v30 }
 0x2b3   : > { %v1389_v27 = vadd.f32 %v2347_v48, %v1350_v53  ;;  %v1250_v31 = vadd.f32 1e-05, %v1186_v14  ;;  %v925_v16 = vpop.xlane.xlu1 %924  ;;  %v1129_v54 = vmul.f32 %v2481_v35, %v2481_v35  ;;  %v1218_v24 = vsub.f32 %v2184_v20, %v2459_v38 }
 0x2b4   : > { %v1388_v23 = vadd.f32 %v2347_v48, %v1349_v21  ;;  %1807 = vrsqrt.f32 %v1251_v39  ;;  %v923_v45 = vpop.xlane.xlu0 %922  ;;  %v2489_v7 = vmul.f32 0.0078125, %v925_v16  ;;  %v1128_v11 = vmul.f32 %v2484_v19, %v2484_v19 }
 0x2b5   : > { %1421 = vst [vmem:[%s2364_s14 + $0x68] sm:$0xff] %v1389_v27  ;;  %1809 = vrsqrt.f32 %v1250_v31  ;;  %v2495_v56 = vmul.f32 0.0078125, %v923_v45 }
 0x2b6   : > { %1420 = vst [vmem:[%s2364_s14 + $0x60] sm:$0xff] %v1388_v23  ;;  %v1127_v22 = vmul.f32 %v2489_v7, %v2489_v7 }
 0x2b7   : > { %v1057_v28 = vpop.xlane.xlu1 %1056  ;;  %v1126_v17 = vmul.f32 %v2495_v56, %v2495_v56 }
 0x2b8   : > { %v1097_v25 = vmul.f32 0.0078125, %v1057_v28  ;;  %v1055_v33 = vpop.xlane.xlu0 %1054 }
 0x2b9   : > { %v1096_v40 = vmul.f32 0.0078125, %v1055_v33 }
 0x2ba   : > { %v1804_v10 = vpop.eup %1803  ;;  %v1161_v62 = vsub.f32 %v1097_v25, %v1129_v54 }
 0x2bb   : > { %v1806_v4 = vpop.eup %1805  ;;  %v1317_v12 = vmul.f32 %v1804_v10, %v1221_v6  ;;  %v1160_v8 = vsub.f32 %v1096_v40, %v1128_v11  ;;  %v1053_v9 = vpop.xlane.xlu1 %1052 }
 0x2bc   : > { %v1316_v51 = vmul.f32 %v1806_v4, %v1220_v59  ;;  %v1193_v18 = vmax.f32 %v1161_v62, 0.0  ;;  %v1095_v13 = vmul.f32 0.0078125, %v1053_v9  ;;  %v1051_v37 = vpop.xlane.xlu0 %1050  ;;  %v1225_v62 = vsub.f32 %v2213_v34, %v2481_v35 }
 0x2bd   : > { %v1356_v0 = vmul.f32 %v2335_v58, %v1317_v12  ;;  %v1192_v52 = vmax.f32 %v1160_v8, 0.0  ;;  %v1094_v42 = vmul.f32 0.0078125, %v1051_v37  ;;  %v1224_v9 = vsub.f32 %v2205_v29, %v2484_v19 }
 0x2be   : > { %v1808_v50 = vpop.eup %1807  ;;  %v1355_v30 = vmul.f32 %v2335_v58, %v1316_v51  ;;  %v1257_v26 = vadd.f32 1e-05, %v1193_v18  ;;  %v1159_v55 = vsub.f32 %v1095_v13, %v1127_v22  ;;  %v1223_v18 = vsub.f32 %v2216_v36, %v2489_v7 }
 0x2bf   : > { %v1810_v1 = vpop.eup %1809  ;;  %v1395_v2 = vadd.f32 %v2347_v48, %v1356_v0  ;;  %v1315_v49 = vmul.f32 %v1808_v50, %v1219_v43  ;;  %v1256_v15 = vadd.f32 1e-05, %v1192_v52  ;;  %v1158_v5 = vsub.f32 %v1094_v42, %v1126_v17  ;;  %v937_v46 = vpop.xlane.xlu1 %936 }
 0x2c0   : > { %v1394_v53 = vadd.f32 %v2347_v48, %v1355_v30  ;;  %v1314_v14 = vmul.f32 %v1810_v1, %v1218_v24  ;;  %1811 = vrsqrt.f32 %v1257_v26  ;;  %v1191_v21 = vmax.f32 %v1159_v55, 0.0  ;;  %v935_v39 = vpop.xlane.xlu0 %934 }
 0x2c1   : > { %1427 = vst [vmem:[%s2364_s14 + $0x98] sm:$0xff] %v1395_v2  ;;  %v1354_v20 = vmul.f32 %v2335_v58, %v1315_v49  ;;  %1813 = vrsqrt.f32 %v1256_v15  ;;  %v1190_v38 = vmax.f32 %v1158_v5, 0.0  ;;  %v2517_v54 = vmul.f32 0.0078125, %v937_v46 }
 0x2c2   : > { %1426 = vst [vmem:[%s2364_s14 + $0x90] sm:$0xff] %v1394_v53  ;;  %v1353_v27 = vmul.f32 %v2335_v58, %v1314_v14  ;;  %v1255_v31 = vadd.f32 1e-05, %v1191_v21  ;;  %v2520_v33 = vmul.f32 0.0078125, %v935_v39  ;;  %v1222_v36 = vsub.f32 %v2210_v32, %v2495_v56 }
 0x2c3   : > { %v1393_v16 = vadd.f32 %v2347_v48, %v1354_v20  ;;  %v1254_v23 = vadd.f32 1e-05, %v1190_v38  ;;  %v933_v45 = vpop.xlane.xlu1 %932  ;;  %v1133_v11 = vmul.f32 %v2517_v54, %v2517_v54 }
 0x2c4   : > { %v1392_v28 = vadd.f32 %v2347_v48, %v1353_v27  ;;  %1815 = vrsqrt.f32 %v1255_v31  ;;  %v931_v25 = vpop.xlane.xlu0 %930  ;;  %v2525_v40 = vmul.f32 0.0078125, %v933_v45  ;;  %v1132_v4 = vmul.f32 %v2520_v33, %v2520_v33 }
 0x2c5   : > { %1425 = vst [vmem:[%s2364_s14 + $0x88] sm:$0xff] %v1393_v16  ;;  %1817 = vrsqrt.f32 %v1254_v23  ;;  %v2531_v43 = vmul.f32 0.0078125, %v931_v25 }
 0x2c6   : > { %1424 = vst [vmem:[%s2364_s14 + $0x80] sm:$0xff] %v1392_v28  ;;  %v1131_v34 = vmul.f32 %v2525_v40, %v2525_v40 }
 0x2c7   : > { %v1065_v6 = vpop.xlane.xlu1 %1064  ;;  %v1130_v29 = vmul.f32 %v2531_v43, %v2531_v43 }
 0x2c8   : > { %v1101_v10 = vmul.f32 0.0078125, %v1065_v6  ;;  %v1063_v59 = vpop.xlane.xlu0 %1062 }
 0x2c9   : > { %v1100_v12 = vmul.f32 0.0078125, %v1063_v59 }
 0x2ca   : > { %v1812_v8 = vpop.eup %1811  ;;  %v1165_v51 = vsub.f32 %v1101_v10, %v1133_v11 }
 0x2cb   : > { %v1814_v22 = vpop.eup %1813  ;;  %v1321_v13 = vmul.f32 %v1812_v8, %v1225_v62  ;;  %v1164_v37 = vsub.f32 %v1100_v12, %v1132_v4  ;;  %v1061_v0 = vpop.xlane.xlu1 %1060  ;;  %v1229_v4 = vsub.f32 %v2237_v47, %v2517_v54 }
 0x2cc   : > { %v1320_v17 = vmul.f32 %v1814_v22, %v1224_v9  ;;  %v1197_v35 = vmax.f32 %v1165_v51, 0.0  ;;  %v1099_v52 = vmul.f32 0.0078125, %v1061_v0  ;;  %v1059_v42 = vpop.xlane.xlu0 %1058  ;;  %v1228_v22 = vsub.f32 %v2227_v41, %v2520_v33 }
 0x2cd   : > { %v1360_v50 = vmul.f32 %v2335_v58, %v1321_v13  ;;  %v1196_v19 = vmax.f32 %v1164_v37, 0.0  ;;  %v1098_v24 = vmul.f32 0.0078125, %v1059_v42  ;;  %v1227_v37 = vsub.f32 %v2241_v60, %v2525_v40 }
 0x2ce   : > { %v1816_v30 = vpop.eup %1815  ;;  %v1359_v7 = vmul.f32 %v2335_v58, %v1320_v17  ;;  %v1261_v26 = vadd.f32 1e-05, %v1197_v35  ;;  %v1163_v55 = vsub.f32 %v1099_v52, %v1131_v34  ;;  %v1226_v60 = vsub.f32 %v2233_v44, %v2531_v43 }
 0x2cf   : > { %v1818_v1 = vpop.eup %1817  ;;  %v1399_v2 = vadd.f32 %v2347_v48, %v1360_v50  ;;  %v1319_v49 = vmul.f32 %v1816_v30, %v1223_v18  ;;  %v1260_v15 = vadd.f32 1e-05, %v1196_v19  ;;  %v1162_v5 = vsub.f32 %v1098_v24, %v1130_v29  ;;  %v945_v46 = vpop.xlane.xlu1 %944 }
 0x2d0   : > { %v1398_v53 = vadd.f32 %v2347_v48, %v1359_v7  ;;  %v1318_v14 = vmul.f32 %v1818_v1, %v1222_v36  ;;  %1819 = vrsqrt.f32 %v1261_v26  ;;  %v1195_v21 = vmax.f32 %v1163_v55, 0.0  ;;  %v943_v39 = vpop.xlane.xlu0 %942 }
 0x2d1   : > { %1431 = vst [vmem:[%s2364_s14 + $0xb8] sm:$0xff] %v1399_v2  ;;  %v1358_v32 = vmul.f32 %v2335_v58, %v1319_v49  ;;  %1821 = vrsqrt.f32 %v1260_v15  ;;  %v1194_v56 = vmax.f32 %v1162_v5, 0.0  ;;  %v2555_v11 = vmul.f32 0.0078125, %v945_v46 }
 0x2d2   : > { %1430 = vst [vmem:[%s2364_s14 + $0xb0] sm:$0xff] %v1398_v53  ;;  %v1357_v20 = vmul.f32 %v2335_v58, %v1318_v14  ;;  %v1259_v38 = vadd.f32 1e-05, %v1195_v21  ;;  %v2559_v12 = vmul.f32 0.0078125, %v943_v39 }
 0x2d3   : > { %v1397_v27 = vadd.f32 %v2347_v48, %v1358_v32  ;;  %v1258_v31 = vadd.f32 1e-05, %v1194_v56  ;;  %v941_v16 = vpop.xlane.xlu1 %940  ;;  %v1137_v47 = vmul.f32 %v2555_v11, %v2555_v11 }
 0x2d4   : > { %v1396_v23 = vadd.f32 %v2347_v48, %v1357_v20  ;;  %1823 = vrsqrt.f32 %v1259_v38  ;;  %v939_v45 = vpop.xlane.xlu0 %938  ;;  %v975_v28 = vmul.f32 0.0078125, %v941_v16  ;;  %v1136_v41 = vmul.f32 %v2559_v12, %v2559_v12 }
 0x2d5   : > { %1429 = vst [vmem:[%s2364_s14 + $0xa8] sm:$0xff] %v1397_v27  ;;  %1825 = vrsqrt.f32 %v1258_v31  ;;  %v974_v25 = vmul.f32 0.0078125, %v939_v45  ;;  %v1233_v31 = vsub.f32 %v2262_v63, %v2555_v11 }
 0x2d6   : > { %1428 = vst [vmem:[%s2364_s14 + $0xa0] sm:$0xff] %v1396_v23  ;;  %v1135_v10 = vmul.f32 %v975_v28, %v975_v28  ;;  %v1231_v39 = vsub.f32 %v2265_v3, %v975_v28  ;;  %v1232_v3 = vsub.f32 %v2254_v57, %v2559_v12 }
 0x2d7   : > { %v1069_v6 = vpop.xlane.xlu1 %1068  ;;  %v1134_v8 = vmul.f32 %v974_v25, %v974_v25  ;;  %v1230_v56 = vsub.f32 %v2259_v61, %v974_v25 }
 0x2d8   : > { %v1103_v59 = vmul.f32 0.0078125, %v1069_v6  ;;  %v1067_v62 = vpop.xlane.xlu0 %1066 }
 0x2d9   : > { %v1102_v9 = vmul.f32 0.0078125, %v1067_v62 }
 0x2da   : > { %v1820_v51 = vpop.eup %1819  ;;  %v1167_v18 = vsub.f32 %v1103_v59, %v1135_v10 }
 0x2db   : > { %v1822_v13 = vpop.eup %1821  ;;  %v1325_v0 = vmul.f32 %v1820_v51, %v1229_v4  ;;  %v1166_v17 = vsub.f32 %v1102_v9, %v1134_v8  ;;  %v1073_v34 = vpop.xlane.xlu1 %1072 }
 0x2dc   : > { %v1324_v35 = vmul.f32 %v1822_v13, %v1228_v22  ;;  %v1199_v54 = vmax.f32 %v1167_v18, 0.0  ;;  %v1105_v52 = vmul.f32 0.0078125, %v1073_v34  ;;  %v1071_v42 = vpop.xlane.xlu0 %1070 }
 0x2dd   : > { %v1364_v50 = vmul.f32 %v2335_v58, %v1325_v0  ;;  %v1198_v33 = vmax.f32 %v1166_v17, 0.0  ;;  %v1104_v29 = vmul.f32 0.0078125, %v1071_v42 }
 0x2de   : > { %v1824_v19 = vpop.eup %1823  ;;  %v1363_v40 = vmul.f32 %v2335_v58, %v1324_v35  ;;  %v1263_v24 = vadd.f32 1e-05, %v1199_v54  ;;  %v1169_v30 = vsub.f32 %v1105_v52, %v1137_v47 }
 0x2df   : > { %v1826_v36 = vpop.eup %1825  ;;  %v1403_v7 = vadd.f32 %v2347_v48, %v1364_v50  ;;  %v1323_v26 = vmul.f32 %v1824_v19, %v1227_v37  ;;  %v1262_v55 = vadd.f32 1e-05, %v1198_v33  ;;  %v1168_v1 = vsub.f32 %v1104_v29, %v1136_v41 }
 0x2e0   : > { %v1402_v2 = vadd.f32 %v2347_v48, %v1363_v40  ;;  %v1322_v49 = vmul.f32 %v1826_v36, %v1226_v60  ;;  %1827 = vrsqrt.f32 %v1263_v24  ;;  %v1201_v15 = vmax.f32 %v1169_v30, 0.0 }
 0x2e1   : > { %1435 = vst [vmem:[%s2364_s14 + $0xd8] sm:$0xff] %v1403_v7  ;;  %v1362_v44 = vmul.f32 %v2335_v58, %v1323_v26  ;;  %1829 = vrsqrt.f32 %v1262_v55  ;;  %v1200_v43 = vmax.f32 %v1168_v1, 0.0 }
 0x2e2   : > { %1434 = vst [vmem:[%s2364_s14 + $0xd0] sm:$0xff] %v1402_v2  ;;  %v1361_v5 = vmul.f32 %v2335_v58, %v1322_v49  ;;  %v1265_v46 = vadd.f32 1e-05, %v1201_v15 }
 0x2e3   : > { %v1401_v53 = vadd.f32 %v2347_v48, %v1362_v44  ;;  %v1264_v14 = vadd.f32 1e-05, %v1200_v43 }
 0x2e4   : > { %v1400_v21 = vadd.f32 %v2347_v48, %v1361_v5  ;;  %1831 = vrsqrt.f32 %v1265_v46 }
 0x2e5   : > { %1433 = vst [vmem:[%s2364_s14 + $0xc8] sm:$0xff] %v1401_v53  ;;  %1833 = vrsqrt.f32 %v1264_v14 }
 0x2e6   : > { %1432 = vst [vmem:[%s2364_s14 + $0xc0] sm:$0xff] %v1400_v21 }
 0x2ea   : > { %v1828_v32 = vpop.eup %1827 }
 0x2eb   : > { %v1830_v20 = vpop.eup %1829  ;;  %v1327_v38 = vmul.f32 %v1828_v32, %v1231_v39 }
 0x2ec   : > { %v1326_v27 = vmul.f32 %v1830_v20, %v1230_v56 }
 0x2ed   : > { %v1366_v16 = vmul.f32 %v2335_v58, %v1327_v38 }
 0x2ee   : > { %v1832_v23 = vpop.eup %1831  ;;  %v1365_v45 = vmul.f32 %v2335_v58, %v1326_v27 }
 0x2ef   : > { %v1834_v28 = vpop.eup %1833  ;;  %v1405_v61 = vadd.f32 %v2347_v48, %v1366_v16  ;;  %v1329_v25 = vmul.f32 %v1832_v23, %v1233_v31 }
 0x2f0   : > { %v1404_v6 = vadd.f32 %v2347_v48, %v1365_v45  ;;  %v1328_v10 = vmul.f32 %v1834_v28, %v1232_v3  ;;  %1447 = sbr.rel (!%p1980_p5) target bundleno = 787 (0x313), region = 52 }
 0x2f1   : > { %1437 = vst [vmem:[%s2364_s14 + $0xe8] sm:$0xff] %v1405_v61  ;;  %v1368_v63 = vmul.f32 %v2335_v58, %v1329_v25 }
 0x2f2   : > { %1436 = vst [vmem:[%s2364_s14 + $0xe0] sm:$0xff] %v1404_v6  ;;  %v1367_v11 = vmul.f32 %v2335_v58, %v1328_v10 }
 0x2f3   : > { %v1407_v59 = vadd.f32 %v2347_v48, %v1368_v63 }
 0x2f4   : > { %v1406_v62 = vadd.f32 %v2347_v48, %v1367_v11 }
 0x2f5   : > { %1439 = vst [vmem:[%s2364_s14 + $0xf8] sm:$0xff] %v1407_v59 }
 0x2f6   : > { %1438 = vst [vmem:[%s2364_s14 + $0xf0] sm:$0xff] %v1406_v62 }
 0x2f7   : > { %s2679_s17 = smov (!%p1450_p11, %s1449_s17), 32 }
 0x2f8   : > { %s2608_s18 = sshll.u32 %s2679_s17, 7 }
 0x2f9   : > { %s1454_s19 = ssub.s32 4096, %s2608_s18 }
 0x2fa   : > { %1455 = vsyncadd %s2603_s16, %s1454_s19  ;;  %p1564_p12 = scmp.ne.s32.totalorder %s2608_s18, 0  ;;  %s1570_s9 = sshll.u32 %s1963_s28, 12 }
 0x2fb   : > { %s2617_s21 = scalar_lea.hbm %s2671_s7, %s1570_s9  ;;  %s1460_s15 = sshll.u32 %s2364_s14, 4  ;;  %s2620_s15 = int_to_ptr.vmem [resolvable:$true] %s1460_s15 }
 0x2fc   : > { %s1835_s22 = scalar_lea.vmem %s2620_s15, %s2608_s18  ;;  %s1899_s23 = smov [#allocation2]  }
 0x2fd   : > { %p1836_p13 = scmp.ne.s32.totalorder %s2620_s15, %s1835_s22  ;;  %s1839_s29 = sshll.u32 %s1899_s23, 4  ;;  %s1840_s29 = int_to_ptr.vmem [resolvable:$false] %s1839_s29 }
 0x2fe   : > { %s1841_s28 = scalar_lea.vmem %s1840_s29, 8192  ;;  %p1842_p2 = scmp.lt.s32.totalorder %s2620_s15, %s1840_s29 }
 0x2ff   : > { %p1837_p0 = pnand %p1836_p13, %p1564_p12  ;;  %p1843_p3 = scmp.lt.s32.totalorder %s1841_s28, %s1835_s22 }
 0x301   : > { %p1838_p1 = pneg %p1837_p0  ;;  %p1844_p4 = por %p1843_p3, %p1842_p2 }
 0x303   : > { %p1845_p5 = pnand %p1844_p4, %p1838_p1 }
 0x305   : > { %1848 = shalt.err (!%p1845_p5)
}
 0x306   : > { %s1849_s8 = scalar_lea.hbm %s2617_s21, %s2608_s18  ;;  %s1853_s17 = scalar_lea.hbm %s2671_s7, 8064 }
 0x307   : > { %p1850_p7 = scmp.ne.s32.totalorder %s2617_s21, %s1849_s8  ;;  %p1854_p10 = scmp.lt.u32.totalorder %s2617_s21, %s2671_s7 }
 0x308   : > { %p1855_p11 = scmp.lt.u32.totalorder %s1853_s17, %s1849_s8  ;;  %p1857_p0 = scmp.lt.u32.totalorder %s1849_s8, %s2617_s21 }
 0x309   : > { %p1851_p8 = pnand %p1850_p7, %p1564_p12 }
 0x30a   : > { %p1856_p13 = por %p1855_p11, %p1854_p10 }
 0x30b   : > { %p1852_p9 = pneg %p1851_p8 }
 0x30c   : > { %p1858_p1 = por %p1857_p0, %p1856_p13 }
 0x30e   : > { %p1859_p2 = pnand %p1858_p1, %p1852_p9 }
 0x310   : > { %1862 = shalt.err (!%p1859_p2)
}
 0x311   : > { %s1900_s20 = smov 128   ;;  %s1901_s11 = smov 8  }
 0x312   : > { %1466 = dma.vmem_to_hbm [thread:$0]  (%p1564_p12), %s2620_s15, %s2608_s18, %s2617_s21, %s2603_s16, %s1900_s20, %s1900_s20, %s1901_s11  }
 0x313 PF: > { %p1724_p3 = scmp.ge.s32.totalorder %s1897_s27, 2  ;;  %s1475_s22 = sand.u32 1, %s1885_s24  }
 0x314   : > { %s1476_s23 = scalar_lea.sflag [#allocation3], %s1475_s22 }
 0x315   : > { %p1721_p4 = pnand %p1724_p3, %p1984_p6 }
 0x317   : > { %1880 = dma.done.wait (!%p1721_p4), %s1476_s23, 4096  }
 0x318   : > { %1882 = vsyncadd (!%p1721_p4), %s1476_s23, 4294963200  ;;  %p17_p5 = scmp.ge.s32.totalorder %s1967_s30, 4   ;;  %s2674_s24 = smov %s1889_s25 }
 0x319   : > { %s2675_s25 = smov %s1893_s26  ;;  %s2676_s26 = smov %s1978_s10 }
 0x31a   : > { %s2677_s27 = smov %s1967_s30  ;;  %19 = sbr.rel (!%p17_p5) target bundleno = 3 (0x3), region = 83 }
 0x321   :  { %1481 = vsyncpa [#allocation3], 1 }
 0x322   :  { %1483 = vsyncpa [#allocation3 + $0x1], 1 }

</bundles_post_ra>
